<compile_context>
chip_gen: v6e
topology: v6e:2x2x1
jax: 0.10.0
libtpu: 0.0.40
codegen_flags: <defaults>
</compile_context>

<pallas_src>
import functools

import jax
import jax.numpy as jnp
from jax.experimental import pallas as pl
from jax.experimental.pallas import tpu as pltpu

_LANE = 128          # vreg lane width  -> feature dims padded to multiples of this
_SUBLANE_BF16 = 16   # bf16 packs 16 sublanes per vreg -> batch tiles padded to this


def _round_up(n, m):
    return (n + m - 1) // m * m


def _mlp_kernel(x_ref,
                w1_ref, b1_ref, w2_ref, b2_ref, w3_ref, b3_ref,
                w4_ref, b4_ref, w5_ref, b5_ref, w6_ref, b6_ref,
                out_ref):
    """One batch tile through the whole 6-layer MLP (activations stay in VMEM)."""

    def linear(h, w_ref, b_ref):
        # bf16 x bf16 -> f32 accumulation on the MXU; bias add stays in f32.
        y = jnp.dot(h.astype(jnp.bfloat16), w_ref[...],
                    preferred_element_type=jnp.float32)
        return y + b_ref[...]                          # (1, N) broadcasts over batch

    h = x_ref[...]                                     # bf16 tile, fed straight to MXU
    h = jnp.maximum(linear(h, w1_ref, b1_ref), 0.0)    # hidden1 + relu
    h = jnp.maximum(linear(h, w2_ref, b2_ref), 0.0)    # hidden2 + (dropout=id) + relu
    h = jnp.maximum(linear(h, w3_ref, b3_ref), 0.0)    # hidden3 + (dropout=id) + relu
    h = jnp.maximum(linear(h, w4_ref, b4_ref), 0.0)    # hidden4 + (dropout=id) + relu
    h = jnp.maximum(linear(h, w5_ref, b5_ref), 0.0)    # hidden5 + (dropout=id) + relu

    logits = linear(h, w6_ref, b6_ref)                 # predict
    # Numerically safe sigmoid: clamp so exp(-x) stays finite, then exp and the
    # approximate reciprocal both use the EUP (free slot).
    logits = jnp.clip(logits, -30.0, 30.0)
    out_ref[...] = pl.reciprocal(1.0 + jnp.exp(-logits),
                                 approx=True).astype(out_ref.dtype)


def pack_params(params):
    """One-time weight packing: pad feature dims to 128 lanes, cast W to bf16.

    Hoisted out of the forward path so the per-call cost is zero (perf review).
    params: list of 6 (W[in, out], b[out]) float32 tuples in layer order.
    Returns a flat tuple (w1, b1, ..., w6, b6) of padded/packed arrays.
    """
    packed = []
    for w, b in params:
        fi, fo = w.shape
        fi_p, fo_p = _round_up(fi, _LANE), _round_up(fo, _LANE)
        w_p = jnp.pad(w, ((0, fi_p - fi), (0, fo_p - fo))).astype(jnp.bfloat16)
        b_p = jnp.pad(b.astype(jnp.float32), (0, fo_p - fo)).reshape(1, fo_p)
        packed += [w_p, b_p]
    return tuple(packed)


def net_gender_ppg_forward(x, packed, *, n_output, batch_tile=1024):
    """Forward pass of Net_gender_ppg.

    x:        [B, n_input] float array.
    packed:   output of pack_params (pre-padded bf16 weights, f32 biases).
    n_output: original (un-padded) number of output classes.
    """
    B, n_input = x.shape
    weights = packed[0::2]
    in_pad = weights[0].shape[0]                      # padded n_input  (>= 128)
    out_pad = weights[-1].shape[1]                    # padded n_output (>= 128)

    # ---- batch tiling: single block for small B, batch_tile rows otherwise ---
    if B <= batch_tile:
        tile_b = _round_up(B, _SUBLANE_BF16)          # whole batch in one block
    else:
        tile_b = _round_up(batch_tile, _SUBLANE_BF16)
    B_pad = _round_up(B, tile_b)
    num_tiles = B_pad // tile_b

    # x streamed in bf16 (half the DMA bytes / VMEM of f32); padding is zeros.
    x_p = jnp.pad(x, ((0, B_pad - B), (0, in_pad - n_input))).astype(jnp.bfloat16)

    # ---- BlockSpecs --------------------------------------------------------
    x_spec = pl.BlockSpec((tile_b, in_pad), lambda i: (i, 0))
    out_spec = pl.BlockSpec((tile_b, out_pad), lambda i: (i, 0))

    # Weights/biases are grid-invariant (constant index_map); when the grid
    # actually iterates, single-buffer them so they don't burn 2x VMEM.
    param_kwargs = dict(pipeline_mode=pl.Buffered(1)) if num_tiles > 1 else {}
    param_specs = [pl.BlockSpec(a.shape, lambda i: (0, 0), **param_kwargs)
                   for a in packed]

    # Megacore split: duplicating the ~1.5 MiB weight DMA per TensorCore is far
    # cheaper than idling one TC, so go parallel from 2 tiles (no-op on 1-TC chips).
    semantics = ("parallel",) if num_tiles >= 2 else ("arbitrary",)
    cp_kwargs = dict(dimension_semantics=semantics)

    # ---- sized VMEM limit (never the full 64 MiB of a v7x TensorCore) -------
    param_bytes = sum(int(a.size) * a.dtype.itemsize for a in packed)
    act_bytes = tile_b * sum(int(w.shape[1]) for w in weights) * 4   # f32 upper bound
    io_bytes = 2 * tile_b * (in_pad + out_pad) * 2                   # bf16 dbl-buffered
    need = param_bytes + act_bytes + io_bytes
    if need > (10 << 20):
        cp_kwargs["vmem_limit_bytes"] = int(min(max(2 * need, 32 << 20), 48 << 20))

    # ---- cost hint for XLA's scheduler around the custom call ----------------
    flops = 2 * B_pad * sum(int(w.shape[0]) * int(w.shape[1]) for w in weights)
    cost = pl.CostEstimate(
        flops=flops,
        transcendentals=B_pad * out_pad,
        bytes_accessed=int(x_p.size) * 2 + B_pad * out_pad * 2 + param_bytes)

    out_padded = pl.pallas_call(
        _mlp_kernel,
        out_shape=jax.ShapeDtypeStruct((B_pad, out_pad), jnp.bfloat16),
        grid_spec=pltpu.PrefetchScalarGridSpec(
            num_scalar_prefetch=0,
            grid=(num_tiles,),
            in_specs=[x_spec] + param_specs,
            out_specs=out_spec,
        ),
        compiler_params=pltpu.CompilerParams(**cp_kwargs),
        cost_estimate=cost,
    )(x_p, *packed)

    return out_padded[:B, :n_output].astype(jnp.float32)


def init_params(key, n_input, n_hidden, out_hidden, n_output):
    """Deterministic init mimicking PyTorch Linear default (U[-1/sqrt(fan_in), ...])."""
    dims = [(n_input, 256),
            (256, n_hidden),
            (n_hidden, 1024),
            (1024, 512),
            (512, out_hidden),
            (out_hidden, n_output)]
    params = []
    for fan_in, fan_out in dims:
        key, kw, kb = jax.random.split(key, 3)
        bound = 1.0 / jnp.sqrt(jnp.float32(fan_in))
        w = jax.random.uniform(kw, (fan_in, fan_out), jnp.float32, -bound, bound)
        b = jax.random.uniform(kb, (fan_out,), jnp.float32, -bound, bound)
        params.append((w, b))
    return params


def reference_forward(x, params):
    """Pure-JAX reference matching the kernel's numerics (bf16 weights, f32 acc)."""
    h = x.astype(jnp.float32)
    n = len(params)
    for idx, (w, b) in enumerate(params):
        y = jnp.dot(h.astype(jnp.bfloat16), w.astype(jnp.bfloat16),
                    preferred_element_type=jnp.float32) + b
        if idx < n - 1:
            h = jnp.maximum(y, 0.0)
        else:
            h = jax.nn.sigmoid(y)
    return h


if __name__ == "__main__":
    # Shapes consistent with the module's forward:
    # n_input=32, n_hidden=64, out_hidden=32, n_output=2, batch=16.
    n_input, n_hidden, out_hidden, n_output = 32, 64, 32, 2
    batch = 16

    key = jax.random.PRNGKey(0)
    key, kx = jax.random.split(key)
    x = jax.random.normal(kx, (batch, n_input), jnp.float32)
    params = init_params(key, n_input, n_hidden, out_hidden, n_output)

    # One-time packing (hoisted out of the forward / jit path).
    packed = jax.block_until_ready(pack_params(params))

    fwd = jax.jit(functools.partial(net_gender_ppg_forward,
                                    n_output=n_output, batch_tile=1024))
    out = jax.block_until_ready(fwd(x, packed))

    ref = reference_forward(x, params)
    assert out.shape == (batch, n_output), out.shape
    assert bool(jnp.allclose(out, ref, atol=2e-2, rtol=2e-2)), "mismatch vs reference"

    print("KERNEL_OK")
</pallas_src>

<mosaic_0001>
module attributes {stable_mosaic.version = 11 : i64} {
  func.func @_mlp_kernel(%arg0: i32, %arg1: memref<16x128xbf16, #tpu.memory_space<vmem>>, %arg2: memref<128x256xbf16, #tpu.memory_space<vmem>>, %arg3: memref<1x256xf32, #tpu.memory_space<vmem>>, %arg4: memref<256x128xbf16, #tpu.memory_space<vmem>>, %arg5: memref<1x128xf32, #tpu.memory_space<vmem>>, %arg6: memref<128x1024xbf16, #tpu.memory_space<vmem>>, %arg7: memref<1x1024xf32, #tpu.memory_space<vmem>>, %arg8: memref<1024x512xbf16, #tpu.memory_space<vmem>>, %arg9: memref<1x512xf32, #tpu.memory_space<vmem>>, %arg10: memref<512x128xbf16, #tpu.memory_space<vmem>>, %arg11: memref<1x128xf32, #tpu.memory_space<vmem>>, %arg12: memref<128x128xbf16, #tpu.memory_space<vmem>>, %arg13: memref<1x128xf32, #tpu.memory_space<vmem>>, %arg14: memref<16x128xbf16, #tpu.memory_space<vmem>>) attributes {dimension_semantics = [#tpu.dimension_semantics<arbitrary>], iteration_bounds = array<i64: 1>, scalar_prefetch = 0 : i64, scratch_operands = 0 : i64, tpu.core_type = #tpu.core_type<tc>, window_params = [{transform_indices = @transform_0, window_bounds = array<i64: 16, 128>}, {pipeline_mode = #tpu.pipeline_mode<synchronous>, transform_indices = @transform_1, window_bounds = array<i64: 128, 256>}, {pipeline_mode = #tpu.pipeline_mode<synchronous>, transform_indices = @transform_2, window_bounds = array<i64: 1, 256>}, {pipeline_mode = #tpu.pipeline_mode<synchronous>, transform_indices = @transform_3, window_bounds = array<i64: 256, 128>}, {pipeline_mode = #tpu.pipeline_mode<synchronous>, transform_indices = @transform_4, window_bounds = array<i64: 1, 128>}, {pipeline_mode = #tpu.pipeline_mode<synchronous>, transform_indices = @transform_5, window_bounds = array<i64: 128, 1024>}, {pipeline_mode = #tpu.pipeline_mode<synchronous>, transform_indices = @transform_6, window_bounds = array<i64: 1, 1024>}, {pipeline_mode = #tpu.pipeline_mode<synchronous>, transform_indices = @transform_7, window_bounds = array<i64: 1024, 512>}, {pipeline_mode = #tpu.pipeline_mode<synchronous>, transform_indices = @transform_8, window_bounds = array<i64: 1, 512>}, {pipeline_mode = #tpu.pipeline_mode<synchronous>, transform_indices = @transform_9, window_bounds = array<i64: 512, 128>}, {pipeline_mode = #tpu.pipeline_mode<synchronous>, transform_indices = @transform_10, window_bounds = array<i64: 1, 128>}, {pipeline_mode = #tpu.pipeline_mode<synchronous>, transform_indices = @transform_11, window_bounds = array<i64: 128, 128>}, {pipeline_mode = #tpu.pipeline_mode<synchronous>, transform_indices = @transform_12, window_bounds = array<i64: 1, 128>}, {transform_indices = @transform_13, window_bounds = array<i64: 16, 128>}]} {
    %c0 = arith.constant 0 : index
    %c0_0 = arith.constant 0 : index
    %0 = vector.load %arg1[%c0, %c0_0] : memref<16x128xbf16, #tpu.memory_space<vmem>>, vector<16x128xbf16>
    %c0_1 = arith.constant 0 : index
    %c0_2 = arith.constant 0 : index
    %1 = vector.load %arg2[%c0_1, %c0_2] : memref<128x256xbf16, #tpu.memory_space<vmem>>, vector<128x256xbf16>
    %cst = arith.constant dense<0.000000e+00> : vector<16x256xf32>
    %2 = tpu.matmul %0, %1, %cst {dimension_numbers = #tpu.dot_dimension_numbers<[1], [0], [0], [1], [0, 0, 1, 1], [], []>} : vector<16x128xbf16>, vector<128x256xbf16>, vector<16x256xf32> -> vector<16x256xf32>
    %c0_3 = arith.constant 0 : index
    %c0_4 = arith.constant 0 : index
    %3 = vector.load %arg3[%c0_3, %c0_4] : memref<1x256xf32, #tpu.memory_space<vmem>>, vector<1x256xf32>
    %4 = vector.broadcast %3 : vector<1x256xf32> to vector<16x256xf32>
    %5 = arith.addf %2, %4 : vector<16x256xf32>
    %cst_5 = arith.constant 0.000000e+00 : f32
    %6 = vector.broadcast %cst_5 : f32 to vector<16x256xf32>
    %7 = arith.maximumf %5, %6 : vector<16x256xf32>
    %8 = arith.truncf %7 : vector<16x256xf32> to vector<16x256xbf16>
    %c0_6 = arith.constant 0 : index
    %c0_7 = arith.constant 0 : index
    %9 = vector.load %arg4[%c0_6, %c0_7] : memref<256x128xbf16, #tpu.memory_space<vmem>>, vector<256x128xbf16>
    %cst_8 = arith.constant dense<0.000000e+00> : vector<16x128xf32>
    %10 = tpu.matmul %8, %9, %cst_8 {dimension_numbers = #tpu.dot_dimension_numbers<[1], [0], [0], [1], [0, 0, 1, 1], [], []>} : vector<16x256xbf16>, vector<256x128xbf16>, vector<16x128xf32> -> vector<16x128xf32>
    %c0_9 = arith.constant 0 : index
    %c0_10 = arith.constant 0 : index
    %11 = vector.load %arg5[%c0_9, %c0_10] : memref<1x128xf32, #tpu.memory_space<vmem>>, vector<1x128xf32>
    %12 = vector.broadcast %11 : vector<1x128xf32> to vector<16x128xf32>
    %13 = arith.addf %10, %12 : vector<16x128xf32>
    %cst_11 = arith.constant 0.000000e+00 : f32
    %14 = vector.broadcast %cst_11 : f32 to vector<16x128xf32>
    %15 = arith.maximumf %13, %14 : vector<16x128xf32>
    %16 = arith.truncf %15 : vector<16x128xf32> to vector<16x128xbf16>
    %c0_12 = arith.constant 0 : index
    %c0_13 = arith.constant 0 : index
    %17 = vector.load %arg6[%c0_12, %c0_13] : memref<128x1024xbf16, #tpu.memory_space<vmem>>, vector<128x1024xbf16>
    %cst_14 = arith.constant dense<0.000000e+00> : vector<16x1024xf32>
    %18 = tpu.matmul %16, %17, %cst_14 {dimension_numbers = #tpu.dot_dimension_numbers<[1], [0], [0], [1], [0, 0, 1, 1], [], []>} : vector<16x128xbf16>, vector<128x1024xbf16>, vector<16x1024xf32> -> vector<16x1024xf32>
    %c0_15 = arith.constant 0 : index
    %c0_16 = arith.constant 0 : index
    %19 = vector.load %arg7[%c0_15, %c0_16] : memref<1x1024xf32, #tpu.memory_space<vmem>>, vector<1x1024xf32>
    %20 = vector.broadcast %19 : vector<1x1024xf32> to vector<16x1024xf32>
    %21 = arith.addf %18, %20 : vector<16x1024xf32>
    %cst_17 = arith.constant 0.000000e+00 : f32
    %22 = vector.broadcast %cst_17 : f32 to vector<16x1024xf32>
    %23 = arith.maximumf %21, %22 : vector<16x1024xf32>
    %24 = arith.truncf %23 : vector<16x1024xf32> to vector<16x1024xbf16>
    %c0_18 = arith.constant 0 : index
    %c0_19 = arith.constant 0 : index
    %25 = vector.load %arg8[%c0_18, %c0_19] : memref<1024x512xbf16, #tpu.memory_space<vmem>>, vector<1024x512xbf16>
    %cst_20 = arith.constant dense<0.000000e+00> : vector<16x512xf32>
    %26 = tpu.matmul %24, %25, %cst_20 {dimension_numbers = #tpu.dot_dimension_numbers<[1], [0], [0], [1], [0, 0, 1, 1], [], []>} : vector<16x1024xbf16>, vector<1024x512xbf16>, vector<16x512xf32> -> vector<16x512xf32>
    %c0_21 = arith.constant 0 : index
    %c0_22 = arith.constant 0 : index
    %27 = vector.load %arg9[%c0_21, %c0_22] : memref<1x512xf32, #tpu.memory_space<vmem>>, vector<1x512xf32>
    %28 = vector.broadcast %27 : vector<1x512xf32> to vector<16x512xf32>
    %29 = arith.addf %26, %28 : vector<16x512xf32>
    %cst_23 = arith.constant 0.000000e+00 : f32
    %30 = vector.broadcast %cst_23 : f32 to vector<16x512xf32>
    %31 = arith.maximumf %29, %30 : vector<16x512xf32>
    %32 = arith.truncf %31 : vector<16x512xf32> to vector<16x512xbf16>
    %c0_24 = arith.constant 0 : index
    %c0_25 = arith.constant 0 : index
    %33 = vector.load %arg10[%c0_24, %c0_25] : memref<512x128xbf16, #tpu.memory_space<vmem>>, vector<512x128xbf16>
    %cst_26 = arith.constant dense<0.000000e+00> : vector<16x128xf32>
    %34 = tpu.matmul %32, %33, %cst_26 {dimension_numbers = #tpu.dot_dimension_numbers<[1], [0], [0], [1], [0, 0, 1, 1], [], []>} : vector<16x512xbf16>, vector<512x128xbf16>, vector<16x128xf32> -> vector<16x128xf32>
    %c0_27 = arith.constant 0 : index
    %c0_28 = arith.constant 0 : index
    %35 = vector.load %arg11[%c0_27, %c0_28] : memref<1x128xf32, #tpu.memory_space<vmem>>, vector<1x128xf32>
    %36 = vector.broadcast %35 : vector<1x128xf32> to vector<16x128xf32>
    %37 = arith.addf %34, %36 : vector<16x128xf32>
    %cst_29 = arith.constant 0.000000e+00 : f32
    %38 = vector.broadcast %cst_29 : f32 to vector<16x128xf32>
    %39 = arith.maximumf %37, %38 : vector<16x128xf32>
    %40 = arith.truncf %39 : vector<16x128xf32> to vector<16x128xbf16>
    %c0_30 = arith.constant 0 : index
    %c0_31 = arith.constant 0 : index
    %41 = vector.load %arg12[%c0_30, %c0_31] : memref<128x128xbf16, #tpu.memory_space<vmem>>, vector<128x128xbf16>
    %cst_32 = arith.constant dense<0.000000e+00> : vector<16x128xf32>
    %42 = tpu.matmul %40, %41, %cst_32 {dimension_numbers = #tpu.dot_dimension_numbers<[1], [0], [0], [1], [0, 0, 1, 1], [], []>} : vector<16x128xbf16>, vector<128x128xbf16>, vector<16x128xf32> -> vector<16x128xf32>
    %c0_33 = arith.constant 0 : index
    %c0_34 = arith.constant 0 : index
    %43 = vector.load %arg13[%c0_33, %c0_34] : memref<1x128xf32, #tpu.memory_space<vmem>>, vector<1x128xf32>
    %44 = vector.broadcast %43 : vector<1x128xf32> to vector<16x128xf32>
    %45 = arith.addf %42, %44 : vector<16x128xf32>
    %cst_35 = arith.constant -3.000000e+01 : f32
    %cst_36 = arith.constant 3.000000e+01 : f32
    %46 = vector.broadcast %cst_35 : f32 to vector<16x128xf32>
    %47 = arith.maximumf %46, %45 : vector<16x128xf32>
    %48 = vector.broadcast %cst_36 : f32 to vector<16x128xf32>
    %49 = arith.minimumf %48, %47 : vector<16x128xf32>
    %cst_37 = arith.constant 0.000000e+00 : f32
    %50 = vector.broadcast %cst_37 : f32 to vector<16x128xf32>
    %51 = arith.subf %50, %49 : vector<16x128xf32>
    %52 = math.exp %51 : vector<16x128xf32>
    %cst_38 = arith.constant 1.000000e+00 : f32
    %53 = vector.broadcast %cst_38 : f32 to vector<16x128xf32>
    %54 = arith.addf %53, %52 : vector<16x128xf32>
    %55 = tpu.reciprocal %54 {approx = true} : vector<16x128xf32> -> vector<16x128xf32>
    %56 = arith.truncf %55 : vector<16x128xf32> to vector<16x128xbf16>
    %c0_39 = arith.constant 0 : index
    %c0_40 = arith.constant 0 : index
    %57 = vector.load %arg14[%c0_39, %c0_40] : memref<16x128xbf16, #tpu.memory_space<vmem>>, vector<16x128xbf16>
    tpu.vector_store %arg14[%c0_39, %c0_40], %56 {strides = array<i32>} : memref<16x128xbf16, #tpu.memory_space<vmem>>, vector<16x128xbf16>,
    return
  }
  func.func @transform_0(%arg0: i32) -> (i32, i32) {
    %c0_i32 = arith.constant 0 : i32
    %c0_i32_0 = arith.constant 0 : i32
    return %arg0, %c0_i32 : i32, i32
  }
  func.func @transform_1(%arg0: i32) -> (i32, i32) {
    %c0_i32 = arith.constant 0 : i32
    %c0_i32_0 = arith.constant 0 : i32
    %c0_i32_1 = arith.constant 0 : i32
    return %c0_i32, %c0_i32_0 : i32, i32
  }
  func.func @transform_2(%arg0: i32) -> (i32, i32) {
    %c0_i32 = arith.constant 0 : i32
    %c0_i32_0 = arith.constant 0 : i32
    %c0_i32_1 = arith.constant 0 : i32
    return %c0_i32, %c0_i32_0 : i32, i32
  }
  func.func @transform_3(%arg0: i32) -> (i32, i32) {
    %c0_i32 = arith.constant 0 : i32
    %c0_i32_0 = arith.constant 0 : i32
    %c0_i32_1 = arith.constant 0 : i32
    return %c0_i32, %c0_i32_0 : i32, i32
  }
  func.func @transform_4(%arg0: i32) -> (i32, i32) {
    %c0_i32 = arith.constant 0 : i32
    %c0_i32_0 = arith.constant 0 : i32
    %c0_i32_1 = arith.constant 0 : i32
    return %c0_i32, %c0_i32_0 : i32, i32
  }
  func.func @transform_5(%arg0: i32) -> (i32, i32) {
    %c0_i32 = arith.constant 0 : i32
    %c0_i32_0 = arith.constant 0 : i32
    %c0_i32_1 = arith.constant 0 : i32
    return %c0_i32, %c0_i32_0 : i32, i32
  }
  func.func @transform_6(%arg0: i32) -> (i32, i32) {
    %c0_i32 = arith.constant 0 : i32
    %c0_i32_0 = arith.constant 0 : i32
    %c0_i32_1 = arith.constant 0 : i32
    return %c0_i32, %c0_i32_0 : i32, i32
  }
  func.func @transform_7(%arg0: i32) -> (i32, i32) {
    %c0_i32 = arith.constant 0 : i32
    %c0_i32_0 = arith.constant 0 : i32
    %c0_i32_1 = arith.constant 0 : i32
    return %c0_i32, %c0_i32_0 : i32, i32
  }
  func.func @transform_8(%arg0: i32) -> (i32, i32) {
    %c0_i32 = arith.constant 0 : i32
    %c0_i32_0 = arith.constant 0 : i32
    %c0_i32_1 = arith.constant 0 : i32
    return %c0_i32, %c0_i32_0 : i32, i32
  }
  func.func @transform_9(%arg0: i32) -> (i32, i32) {
    %c0_i32 = arith.constant 0 : i32
    %c0_i32_0 = arith.constant 0 : i32
    %c0_i32_1 = arith.constant 0 : i32
    return %c0_i32, %c0_i32_0 : i32, i32
  }
  func.func @transform_10(%arg0: i32) -> (i32, i32) {
    %c0_i32 = arith.constant 0 : i32
    %c0_i32_0 = arith.constant 0 : i32
    %c0_i32_1 = arith.constant 0 : i32
    return %c0_i32, %c0_i32_0 : i32, i32
  }
  func.func @transform_11(%arg0: i32) -> (i32, i32) {
    %c0_i32 = arith.constant 0 : i32
    %c0_i32_0 = arith.constant 0 : i32
    %c0_i32_1 = arith.constant 0 : i32
    return %c0_i32, %c0_i32_0 : i32, i32
  }
  func.func @transform_12(%arg0: i32) -> (i32, i32) {
    %c0_i32 = arith.constant 0 : i32
    %c0_i32_0 = arith.constant 0 : i32
    %c0_i32_1 = arith.constant 0 : i32
    return %c0_i32, %c0_i32_0 : i32, i32
  }
  func.func @transform_13(%arg0: i32) -> (i32, i32) {
    %c0_i32 = arith.constant 0 : i32
    %c0_i32_0 = arith.constant 0 : i32
    return %arg0, %c0_i32 : i32, i32
  }
}

</mosaic_0001>

<bundles_post_ra>
// kernel: net_gender_ppg_forward.1
= control target key start
LH: loop header
LB: loop body
LE: loop exit
PB: predicated region body
PF: predicated region fallthrough
CT: control target
= control target key end

     0   :  { %18 = vsyncpa [#allocation3], 0  ;;  %s4865_s0 = inlined_call_operand.vmem [shape: bf16[16,128], index: 0, kind: input, shape index: {}]   ;;  %s4866_s1 = inlined_call_operand.hbm [shape: bf16[128,256], index: 1, kind: input, shape index: {}]   ;;  %s4867_s2 = inlined_call_operand.vmem [shape: f32[1,256], index: 2, kind: input, shape index: {}]   ;;  %s4868_s3 = inlined_call_operand.hbm [shape: bf16[256,128], index: 3, kind: input, shape index: {}]   ;;  %s4869_s4 = inlined_call_operand.vmem [shape: f32[1,128], index: 4, kind: input, shape index: {}]   ;;  %s4870_s5 = inlined_call_operand.hbm [shape: bf16[128,1024], index: 5, kind: input, shape index: {}]   ;;  %s4871_s6 = inlined_call_operand.vmem [shape: f32[1,1024], index: 6, kind: input, shape index: {}]   ;;  %s4872_s7 = inlined_call_operand.hbm [shape: bf16[1024,512], index: 7, kind: input, shape index: {}]   ;;  %s4873_s8 = inlined_call_operand.vmem [shape: f32[1,512], index: 8, kind: input, shape index: {}]   ;;  %s4874_s9 = inlined_call_operand.hbm [shape: bf16[512,128], index: 9, kind: input, shape index: {}]   ;;  %s4875_s10 = inlined_call_operand.vmem [shape: f32[1,128], index: 10, kind: input, shape index: {}]   ;;  %s4876_s11 = inlined_call_operand.hbm [shape: bf16[128,128], index: 11, kind: input, shape index: {}]   ;;  %s4877_s12 = inlined_call_operand.vmem [shape: f32[1,128], index: 12, kind: input, shape index: {}]   ;;  %s4878_s13 = inlined_call_operand.vmem [shape: bf16[16,128], index: 13, kind: output, shape index: {}]  }
   0x1   :  { %19 = vsyncpa [#allocation5], 0 }
   0x2   :  { %20 = vsyncpa [#allocation8], 0 }
   0x3   :  { %21 = vsyncpa [#allocation11], 0  ;;  %s4619_s25 = smov [#allocation4]  }
   0x4   :  { %s43_s26 = sshll.u32 %s4619_s25, 4  ;;  %s44_s26 = int_to_ptr.vmem [resolvable:$true] %s43_s26 }
   0x5   :  { %s4499_s27 = scalar_lea.vmem %s44_s26, 2048  ;;  %p4504_p1 = scmp.lt.s32.totalorder %s44_s26, %s44_s26 }
   0x6   :  { %p4500_p0 = scmp.ne.s32.totalorder %s44_s26, %s4499_s27  ;;  %p4505_p2 = scmp.lt.s32.totalorder %s4499_s27, %s4499_s27 }
   0x8   :  { %p4506_p3 = por %p4505_p2, %p4504_p1 }
   0xa   :  { %p4507_p4 = pnand %p4506_p3, %p4500_p0 }
   0xc   :  { %4510 = shalt.err (!%p4507_p4)
}
   0xd   :  { %s4620_s28 = smov 64   ;;  %s4621_s29 = smov 4  }
   0xe   :  { %49 = dma.hbm_to_vmem [thread:$0]  %s4868_s3, 2048, %s44_s26, [#allocation5], %s4620_s28, %s4620_s28, %s4621_s29  }
   0xf   :  { %s4622_s15 = smov [#allocation7]  }
  0x10   :  { %s71_s16 = sshll.u32 %s4622_s15, 4  ;;  %s72_s16 = int_to_ptr.vmem [resolvable:$true] %s71_s16 }
  0x11   :  { %s4519_s17 = scalar_lea.vmem %s72_s16, 32768  ;;  %p4524_p6 = scmp.lt.s32.totalorder %s72_s16, %s72_s16 }
  0x12   :  { %p4520_p5 = scmp.ne.s32.totalorder %s72_s16, %s4519_s17  ;;  %p4525_p7 = scmp.lt.s32.totalorder %s4519_s17, %s4519_s17 }
  0x14   :  { %p4526_p8 = por %p4525_p7, %p4524_p6 }
  0x16   :  { %p4527_p9 = pnand %p4526_p8, %p4520_p5 }
  0x18   :  { %4530 = shalt.err (!%p4527_p9)
}
  0x19   :  { %s4623_s18 = smov 256   ;;  %s4624_s19 = smov 16  }
  0x1a   :  { %77 = dma.hbm_to_vmem [thread:$0]  %s4872_s7, 32768, %s72_s16, [#allocation8], %s4623_s18, %s4623_s18, %s4624_s19  }
  0x1b   :  { %s4625_s22 = smov [#allocation2]  }
  0x1c   :  { %s29_s23 = sshll.u32 %s4625_s22, 4  ;;  %s30_s23 = int_to_ptr.vmem [resolvable:$true] %s29_s23 }
  0x1d   :  { %s4539_s3 = scalar_lea.vmem %s30_s23, 2048  ;;  %p4544_p11 = scmp.lt.s32.totalorder %s30_s23, %s30_s23 }
  0x1e   :  { %p4540_p10 = scmp.ne.s32.totalorder %s30_s23, %s4539_s3  ;;  %p4545_p12 = scmp.lt.s32.totalorder %s4539_s3, %s4539_s3 }
  0x20   :  { %p4546_p13 = por %p4545_p12, %p4544_p11 }
  0x22   :  { %p4547_p0 = pnand %p4546_p13, %p4540_p10 }
  0x24   :  { %4550 = shalt.err (!%p4547_p0)
}
  0x25   :  { %s4626_s24 = smov 128   ;;  %s4627_s25 = smov 8  }
  0x26   :  { %35 = dma.hbm_to_vmem [thread:$0]  %s4866_s1, 2048, %s30_s23, [#allocation3], %s4626_s24, %s4626_s24, %s4627_s25  }
  0x27   :  { %s4628_s30 = smov [#allocation6]  }
  0x28   :  { %s57_s14 = sshll.u32 %s4628_s30, 4  ;;  %s58_s14 = int_to_ptr.vmem [resolvable:$true] %s57_s14 }
  0x29   :  { %s4559_s7 = scalar_lea.vmem %s58_s14, 8192  ;;  %p4564_p2 = scmp.lt.s32.totalorder %s58_s14, %s58_s14 }
  0x2a   :  { %p4560_p1 = scmp.ne.s32.totalorder %s58_s14, %s4559_s7  ;;  %p4565_p3 = scmp.lt.s32.totalorder %s4559_s7, %s4559_s7 }
  0x2c   :  { %p4566_p4 = por %p4565_p3, %p4564_p2 }
  0x2e   :  { %p4567_p5 = pnand %p4566_p4, %p4560_p1 }
  0x30   :  { %4570 = shalt.err (!%p4567_p5)
}
  0x31   :  { %s4629_s15 = smov 512   ;;  %s4630_s16 = smov 32  }
  0x32   :  { %63 = dma.hbm_to_vmem [thread:$0]  %s4870_s5, 8192, %s58_s14, [#allocation5], %s4629_s15, %s4629_s15, %s4630_s16  }
  0x33   :  { %s4631_s19 = smov [#allocation9]   ;;  %s4632_s21 = smov [#allocation10]  }
  0x34   :  { %s85_s20 = sshll.u32 %s4631_s19, 4  ;;  %s99_s1 = sshll.u32 %s4632_s21, 4  ;;  %s86_s20 = int_to_ptr.vmem [resolvable:$true] %s85_s20  ;;  %s100_s1 = int_to_ptr.vmem [resolvable:$true] %s99_s1 }
  0x35   :  { %s4579_s22 = scalar_lea.vmem %s86_s20, 4096  ;;  %p4584_p7 = scmp.lt.s32.totalorder %s86_s20, %s86_s20 }
  0x36   :  { %p4580_p6 = scmp.ne.s32.totalorder %s86_s20, %s4579_s22  ;;  %p4585_p8 = scmp.lt.s32.totalorder %s4579_s22, %s4579_s22 }
  0x38   :  { %p4586_p9 = por %p4585_p8, %p4584_p7 }
  0x3a   :  { %p4587_p10 = pnand %p4586_p9, %p4580_p6 }
  0x3c   :  { %4590 = shalt.err (!%p4587_p10)
}
  0x3d   :  { %91 = dma.hbm_to_vmem [thread:$0]  %s4874_s9, 4096, %s86_s20, [#allocation8], %s4620_s28, %s4620_s28, %s4621_s29  }
  0x3e   :  { %s4599_s5 = scalar_lea.vmem %s100_s1, 1024  ;;  %p4604_p12 = scmp.lt.s32.totalorder %s100_s1, %s100_s1 }
  0x3f   :  { %p4600_p11 = scmp.ne.s32.totalorder %s100_s1, %s4599_s5  ;;  %p4605_p13 = scmp.lt.s32.totalorder %s4599_s5, %s4599_s5 }
  0x41   :  { %p4606_p0 = por %p4605_p13, %p4604_p12 }
  0x43   :  { %p4607_p1 = pnand %p4606_p0, %p4600_p11 }
  0x45   :  { %4610 = shalt.err (!%p4607_p1)
}
  0x46   :  { %105 = dma.hbm_to_vmem [thread:$0]  %s4876_s11, 1024, %s100_s1, [#allocation11], %s4620_s28, %s4620_s28, %s4621_s29  }
  0x47   :  { %4611 = dma.done.wait [#allocation3], 2048  }
  0x48   :  { %4612 = vsyncadd [#allocation3], 4294965248 }
  0x49   :  { %4613 = dma.done.wait [#allocation5], 10240  }
  0x4a   :  { %4614 = vsyncadd [#allocation5], 4294957056 }
  0x4b   :  { %4615 = dma.done.wait [#allocation8], 36864  }
  0x4c   :  { %4616 = vsyncadd [#allocation8], 4294930432 }
  0x4d   :  { %4617 = dma.done.wait [#allocation11], 1024  }
  0x4e   :  { %4618 = vsyncadd [#allocation11], 4294966272  ;;  %v4633_v0 = vmov 0   ;;  %v4018_v1 = vld [vmem:[#allocation2 + $0x74] ss:$8 sps:$4 sm:$0xff]   ;;  %v4047_v16 = vld [vmem:[#allocation4 + $0x68] sm:$0xff]   ;;  %v147_v58 = vlaneseq }
  0x4f   :  { %275 = vmatprep.mubr.bf16.mxu0 %v4633_v0  ;;  %v4020_v2 = vld [vmem:[#allocation2 + $0x70] ss:$8 sps:$4 sm:$0xff]   ;;  %243 = vmatprep.subr.bf16.mxu0 %v4018_v1  ;;  %v4021_v3 = vld [vmem:[#allocation2 + $0x64] ss:$8 sps:$4 sm:$0xff]   ;;  %v4023_v4 = vld [vmem:[#allocation2 + $0x60] ss:$8 sps:$4 sm:$0xff]  }
  0x50   :  { %244 = vmatpush1.bf16.msra.mxu0 %v4020_v2  ;;  %v4024_v5 = vld [vmem:[#allocation2 + $0x54] ss:$8 sps:$4 sm:$0xff]   ;;  %v4026_v6 = vld [vmem:[#allocation2 + $0x50] ss:$8 sps:$4 sm:$0xff]   ;;  %v4027_v7 = vld [vmem:[#allocation2 + $0x44] ss:$8 sps:$4 sm:$0xff]  }
  0x51   :  { %245 = vmatprep.subr.bf16.mxu0 %v4021_v3  ;;  %v4029_v8 = vld [vmem:[#allocation2 + $0x40] ss:$8 sps:$4 sm:$0xff]   ;;  %v4030_v9 = vld [vmem:[#allocation2 + $0x34] ss:$8 sps:$4 sm:$0xff]   ;;  %v4032_v11 = vld [vmem:[#allocation2 + $0x30] ss:$8 sps:$4 sm:$0xff]  }
  0x52   :  { %v4043_v10 = vld [vmem:[#allocation4 + $0x78] sm:$0xff]   ;;  %v4033_v13 = vld [vmem:[#allocation2 + $0x24] ss:$8 sps:$4 sm:$0xff]   ;;  %v4045_v14 = vld [vmem:[#allocation4 + $0x70] sm:$0xff]   ;;  %v4738_v59 = vshrl.u32 %v147_v58, 7  ;;  %vm4635_vm0 = vmmov 0  }
  0x53   :  { %v4044_v12 = vld [vmem:[#allocation4 + $0x38] sm:$0xff]   ;;  %3906 = vmatprep.subr.bf16.mxu1 %v4043_v10  ;;  %v4046_v15 = vld [vmem:[#allocation4 + $0x30] sm:$0xff]   ;;  %v4035_v17 = vld [vmem:[#allocation2 + $0x20] ss:$8 sps:$4 sm:$0xff]  }
  0x54   :  { %246 = vmatpush1.bf16.msra.mxu0 %v4023_v4  ;;  %3907 = vmatpush3.bf16.msra.mxu1 %v4044_v12  ;;  %v4036_v18 = vld [vmem:[#allocation2 + $0x14] ss:$8 sps:$4 sm:$0xff]   ;;  %v4048_v19 = vld [vmem:[#allocation4 + $0x28] sm:$0xff]   ;;  %v4049_v20 = vld [vmem:[#allocation4 + $0x60] sm:$0xff]   ;;  %v4741_v60 = vsub.s32 1, %v4738_v59  ;;  %v4744_v61 = vsub.s32 0, %v4738_v59 }
  0x55   :  { %247 = vmatprep.subr.bf16.mxu0 %v4024_v5  ;;  %3908 = vmatprep.subr.bf16.mxu1 %v4045_v14  ;;  %v4038_v21 = vld [vmem:[#allocation2 + $0x10] ss:$8 sps:$4 sm:$0xff]   ;;  %v4050_v22 = vld [vmem:[#allocation4 + $0x20] sm:$0xff]   ;;  %v4055_v30 = vld [vmem:[#allocation4 + $0x48] sm:$0xff]  }
  0x56   :  { %v4039_v23 = vld [vmem:[#allocation2 + $0x4] ss:$8 sps:$4 sm:$0xff]   ;;  %v4051_v24 = vld [vmem:[#allocation4 + $0x58] sm:$0xff]   ;;  %v4041_v25 = vld [vmem:[#allocation2] ss:$8 sps:$4 sm:$0xff]  }
  0x57   :  { %v4052_v26 = vld [vmem:[#allocation4 + $0x18] sm:$0xff]   ;;  %v4042_v27 = vld [vmem:[%s4865_s0] sm:$0xff]   ;;  %v4053_v28 = vld [vmem:[#allocation4 + $0x50] sm:$0xff]  }
  0x58   :  { %248 = vmatpush1.bf16.msra.mxu0 %v4026_v6  ;;  %3909 = vmatpush3.bf16.msra.mxu1 %v4046_v15  ;;  %v4054_v29 = vld [vmem:[#allocation4 + $0x10] sm:$0xff]   ;;  %v4056_v31 = vld [vmem:[#allocation4 + $0x8] sm:$0xff]   ;;  %v4057_v32 = vld [vmem:[#allocation4 + $0x40] sm:$0xff]  }
  0x59   :  { %249 = vmatprep.subr.bf16.mxu0 %v4027_v7  ;;  %3910 = vmatprep.subr.bf16.mxu1 %v4047_v16  ;;  %v4058_v33 = vld [vmem:[#allocation4] sm:$0xff]   ;;  %v528_v36 = vld [vmem:[#allocation6 + $0x1c8] sm:$0xff]  ;;  %v530_v58 = vld [vmem:[#allocation6 + $0x1d8] sm:$0xff] }
  0x5a   :  { %v527_v34 = vld [vmem:[#allocation6 + $0x1c0] sm:$0xff]  ;;  %v532_v39 = vld [vmem:[#allocation6 + $0x1e8] sm:$0xff] }
  0x5b   :  { %v531_v35 = vld [vmem:[#allocation6 + $0x1e0] sm:$0xff]  ;;  %v3591_v42 = vcombine.low %v528_v36, %v532_v39  ;;  %v3592_v43 = vcombine.high %v528_v36, %v532_v39  ;;  %v524_v14 = vld [vmem:[#allocation6 + $0x1a8] sm:$0xff] }
  0x5c   :  { %250 = vmatpush1.bf16.msra.mxu0 %v4029_v8  ;;  %3911 = vmatpush3.bf16.msra.mxu1 %v4048_v19  ;;  %v3589_v37 = vcombine.low %v527_v34, %v531_v35  ;;  %v3590_v38 = vcombine.high %v527_v34, %v531_v35  ;;  %v519_v40 = vld [vmem:[#allocation6 + $0x180] sm:$0xff]  ;;  %v512_v19 = vld [vmem:[#allocation6 + $0x148] sm:$0xff] }
  0x5d   :  { %251 = vmatprep.subr.bf16.mxu0 %v4030_v9  ;;  %3912 = vmatprep.subr.bf16.mxu1 %v4049_v20  ;;  %v523_v41 = vld [vmem:[#allocation6 + $0x1a0] sm:$0xff]  ;;  %v516_v20 = vld [vmem:[#allocation6 + $0x168] sm:$0xff] }
  0x5e   :  { %v3582_v44 = vcombine.high %v519_v40, %v523_v41  ;;  %v3581_v45 = vcombine.low %v519_v40, %v523_v41  ;;  %v511_v46 = vld [vmem:[#allocation6 + $0x140] sm:$0xff]  ;;  %v488_v34 = vld [vmem:[#allocation6 + $0x88] sm:$0xff] }
  0x5f   :  { %v515_v47 = vld [vmem:[#allocation6 + $0x160] sm:$0xff]  ;;  %v492_v36 = vld [vmem:[#allocation6 + $0xa8] sm:$0xff] }
  0x60   :  { %252 = vmatpush1.bf16.msra.mxu0 %v4032_v11  ;;  %3913 = vmatpush3.bf16.msra.mxu1 %v4050_v22  ;;  %v3574_v48 = vcombine.high %v511_v46, %v515_v47  ;;  %v3573_v49 = vcombine.low %v511_v46, %v515_v47  ;;  %v503_v50 = vld [vmem:[#allocation6 + $0x100] sm:$0xff]  ;;  %v3576_v22 = vcombine.high %v512_v19, %v516_v20 }
  0x61   :  { %253 = vmatprep.subr.bf16.mxu0 %v4033_v13  ;;  %3914 = vmatprep.subr.bf16.mxu1 %v4051_v24  ;;  %v507_v51 = vld [vmem:[#allocation6 + $0x120] sm:$0xff]  ;;  %v520_v13 = vld [vmem:[#allocation6 + $0x188] sm:$0xff]  ;;  %v3552_v39 = vcombine.high %v488_v34, %v492_v36 }
  0x62   :  { %v3566_v52 = vcombine.high %v503_v50, %v507_v51  ;;  %v3565_v53 = vcombine.low %v503_v50, %v507_v51  ;;  %v495_v54 = vld [vmem:[#allocation6 + $0xc0] sm:$0xff]  ;;  %v508_v24 = vld [vmem:[#allocation6 + $0x128] sm:$0xff] }
  0x63   :  { %v499_v55 = vld [vmem:[#allocation6 + $0xe0] sm:$0xff]  ;;  %v472_v50 = vld [vmem:[#allocation6 + $0x8] sm:$0xff] }
  0x64   :  { %254 = vmatpush1.bf16.msra.mxu0 %v4035_v17  ;;  %3915 = vmatpush3.bf16.msra.mxu1 %v4052_v26  ;;  %v3558_v56 = vcombine.high %v495_v54, %v499_v55  ;;  %v3557_v57 = vcombine.low %v495_v54, %v499_v55  ;;  %v145_v62 = vld [vmem:[%s4867_s2] sm:$0x3] }
  0x65   :  { %255 = vmatprep.subr.bf16.mxu0 %v4036_v18  ;;  %3916 = vmatprep.subr.bf16.mxu1 %v4053_v28  ;;  %v154_v1 = vrot.slane %v145_v62, %v4741_v60  ;;  %v150_v2 = vrot.slane %v145_v62, %v4744_v61  ;;  %v3584_v18 = vcombine.high %v520_v13, %v524_v14  ;;  %v500_v28 = vld [vmem:[#allocation6 + $0xe8] sm:$0xff]  ;;  %v479_v40 = vld [vmem:[#allocation6 + $0x40] sm:$0xff] }
  0x66   :  { %v483_v41 = vld [vmem:[#allocation6 + $0x60] sm:$0xff] }
  0x68   :  { %256 = vmatpush1.bf16.msra.mxu0 %v4038_v21  ;;  %3917 = vmatpush3.bf16.msra.mxu1 %v4054_v29  ;;  %v3583_v21 = vcombine.low %v520_v13, %v524_v14  ;;  %v521_v13 = vld [vmem:[#allocation6 + $0x190] sm:$0xff] }
  0x69   :  { %257 = vmatprep.subr.bf16.mxu0 %v4039_v23  ;;  %3918 = vmatprep.subr.bf16.mxu1 %v4055_v30  ;;  %v504_v23 = vld [vmem:[#allocation6 + $0x108] sm:$0xff]  ;;  %v525_v14 = vld [vmem:[#allocation6 + $0x1b0] sm:$0xff] }
  0x6a   :  { %v3568_v26 = vcombine.high %v504_v23, %v508_v24  ;;  %v3567_v29 = vcombine.low %v504_v23, %v508_v24  ;;  %v517_v23 = vld [vmem:[#allocation6 + $0x170] sm:$0xff]  ;;  %v514_v24 = vld [vmem:[#allocation6 + $0x158] sm:$0xff] }
  0x6c   :  { %258 = vmatpush1.bf16.msra.mxu0 %v4041_v25  ;;  %3919 = vmatpush3.bf16.msra.mxu1 %v4056_v31  ;;  %v3575_v25 = vcombine.low %v512_v19, %v516_v20  ;;  %v3586_v20 = vcombine.high %v521_v13, %v525_v14 }
  0x6d   :  { %3920 = vmatprep.subr.bf16.mxu1 %v4057_v32  ;;  %897 = vmatprep.subr.bf16.mxu0 %v3590_v38  ;;  %v487_v32 = vld [vmem:[#allocation6 + $0x80] sm:$0xff]  ;;  %v3551_v38 = vcombine.low %v488_v34, %v492_v36 }
  0x6f   :  { %276 = vmatmul.mubr.bf16.vlgmr.msra.gmra.mxu0 %v4042_v27  ;;  %v496_v27 = vld [vmem:[#allocation6 + $0xc8] sm:$0xff] }
  0x70   :  { %929 = vmatprep.mubr.bf16.mxu0 %v4633_v0  ;;  %3921 = vmatpush3.bf16.msra.mxu1 %v4058_v33  ;;  %v3560_v30 = vcombine.high %v496_v27, %v500_v28  ;;  %v3559_v31 = vcombine.low %v496_v27, %v500_v28  ;;  %v491_v33 = vld [vmem:[#allocation6 + $0xa0] sm:$0xff] }
  0x71   :  { %940 = vmatprep.subr.bf16.mxu1 %v3592_v43  ;;  %898 = vmatpush1.bf16.msra.mxu0 %v3589_v37  ;;  %v3550_v35 = vcombine.high %v487_v32, %v491_v33  ;;  %v3549_v37 = vcombine.low %v487_v32, %v491_v33  ;;  %v3542_v43 = vcombine.high %v479_v40, %v483_v41  ;;  %v506_v32 = vld [vmem:[#allocation6 + $0x118] sm:$0xff] }
  0x72   :  { %899 = vmatprep.subr.bf16.mxu0 %v3582_v44  ;;  %v484_v44 = vld [vmem:[#allocation6 + $0x68] sm:$0xff]  ;;  %v510_v33 = vld [vmem:[#allocation6 + $0x138] sm:$0xff] }
  0x75   :  { %900 = vmatpush1.bf16.msra.mxu0 %v3581_v45  ;;  %v3541_v45 = vcombine.low %v479_v40, %v483_v41  ;;  %v498_v40 = vld [vmem:[#allocation6 + $0xd8] sm:$0xff] }
  0x76   :  { %901 = vmatprep.subr.bf16.mxu0 %v3574_v48  ;;  %v471_v48 = vld [vmem:[#allocation6] sm:$0xff]  ;;  %v502_v41 = vld [vmem:[#allocation6 + $0xf8] sm:$0xff] }
  0x79   :  { %902 = vmatpush1.bf16.msra.mxu0 %v3573_v49  ;;  %v475_v49 = vld [vmem:[#allocation6 + $0x20] sm:$0xff] }
  0x7a   :  { %903 = vmatprep.subr.bf16.mxu0 %v3566_v52  ;;  %v3534_v51 = vcombine.high %v471_v48, %v475_v49  ;;  %v476_v52 = vld [vmem:[#allocation6 + $0x28] sm:$0xff] }
  0x7b   :  { %v3535_v54 = vcombine.low %v472_v50, %v476_v52  ;;  %v3536_v55 = vcombine.high %v472_v50, %v476_v52  ;;  %v3563_v50 = vcombine.low %v498_v40, %v502_v41 }
  0x7d   :  { %904 = vmatpush1.bf16.msra.mxu0 %v3565_v53  ;;  %v3533_v53 = vcombine.low %v471_v48, %v475_v49  ;;  %v494_v48 = vld [vmem:[#allocation6 + $0xb8] sm:$0xff] }
  0x7e   :  { %905 = vmatprep.subr.bf16.mxu0 %v3558_v56  ;;  %v529_v56 = vld [vmem:[#allocation6 + $0x1d0] sm:$0xff] }
  0x81   :  { %906 = vmatpush1.bf16.msra.mxu0 %v3557_v57  ;;  %v533_v57 = vld [vmem:[#allocation6 + $0x1f0] sm:$0xff] }
  0x82   :  { %907 = vmatprep.subr.bf16.mxu0 %v3550_v35  ;;  %v3594_v62 = vcombine.high %v529_v56, %v533_v57 }
  0x85   :  { %908 = vmatpush1.bf16.msra.mxu0 %v3549_v37  ;;  %v3572_v37 = vcombine.high %v506_v32, %v510_v33 }
  0x86   :  { %909 = vmatprep.subr.bf16.mxu0 %v3542_v43  ;;  %v3571_v43 = vcombine.low %v506_v32, %v510_v33  ;;  %v4094_v32 = vld [vmem:[#allocation7 + $0x244] ss:$16 sps:$4 sm:$0xff]   ;;  %v4089_v33 = vld [vmem:[#allocation7 + $0x40] ss:$16 sps:$4 sm:$0xff]  }
  0x89   :  { %910 = vmatpush1.bf16.msra.mxu0 %v3541_v45  ;;  %v489_v45 = vld [vmem:[#allocation6 + $0x90] sm:$0xff] }
  0x8a   :  { %911 = vmatprep.subr.bf16.mxu0 %v3534_v51 }
  0x8d   :  { %912 = vmatpush1.bf16.msra.mxu0 %v3533_v53  ;;  %v481_v53 = vld [vmem:[#allocation6 + $0x50] sm:$0xff] }
  0x8e   :  { %983 = vmatprep.subr.bf16.mxu0 %v3594_v62 }
 0x12f   :  { %v277_v63 = vpop.f32.mrf.mxu0 }
 0x130   :  { %v278_v7 = vadd.f32 %v277_v63, %v150_v2  ;;  %v534_v63 = vld [vmem:[#allocation6 + $0x1f8] sm:$0xff] }
 0x131   :  { %v279_v3 = vpop.f32.mrf.mxu0 }
 0x132   :  { %v280_v5 = vadd.f32 %v279_v3, %v154_v1  ;;  %v286_v15 = vmax.f32 %v278_v7, 0.0  ;;  %v3596_v3 = vcombine.high %v530_v58, %v534_v63  ;;  %v3516_v7 = vld [vmem:[%s4869_s4] ss:$0 sm:$0xff] }
 0x133   :  { %v281_v4 = vpop.f32.mrf.mxu0 }
 0x134   :  { %v282_v6 = vadd.f32 %v281_v4, %v150_v2  ;;  %v287_v11 = vmax.f32 %v280_v5, 0.0  ;;  %v3595_v2 = vcombine.low %v530_v58, %v534_v63 }
 0x135   :  { %v283_v8 = vpop.f32.mrf.mxu0 }
 0x136   :  { %v284_v9 = vadd.f32 %v283_v8, %v154_v1  ;;  %v288_v10 = vmax.f32 %v282_v6, 0.0  ;;  %v3593_v1 = vcombine.low %v529_v56, %v533_v57  ;;  %v486_v56 = vld [vmem:[#allocation6 + $0x78] sm:$0xff] }
 0x138   :  { %v289_v12 = vmax.f32 %v284_v9, 0.0  ;;  %v290_v17 = vpack.c.bf16 %v288_v10, %v286_v15  ;;  %v522_v15 = vld [vmem:[#allocation6 + $0x198] sm:$0xff] }
 0x13a   :  { %v291_v16 = vpack.c.bf16 %v289_v12, %v287_v11 }
 0x13c   :  { %459 = vmatprep.mubr.bf16.mxu1 %v291_v16  ;;  %v526_v16 = vld [vmem:[#allocation6 + $0x1b8] sm:$0xff] }
 0x13d   :  { %460 = vmatmul.mubr.bf16.vlgmr.msra.gmra.mxu1 %v290_v17  ;;  %v3587_v27 = vcombine.low %v522_v15, %v526_v16 }
 0x13e   :  { %941 = vmatpush1.bf16.msra.mxu1 %v3591_v42  ;;  %972 = vmatprep.mubr.bf16.mxu1 %v4633_v0  ;;  %v480_v42 = vld [vmem:[#allocation6 + $0x48] sm:$0xff] }
 0x13f   :  { %942 = vmatprep.subr.bf16.mxu1 %v3584_v18  ;;  %v3543_v46 = vcombine.low %v480_v42, %v484_v44  ;;  %v3544_v47 = vcombine.high %v480_v42, %v484_v44 }
 0x142   :  { %943 = vmatpush1.bf16.msra.mxu1 %v3583_v21  ;;  %v3588_v21 = vcombine.high %v522_v15, %v526_v16  ;;  %v4067_v15 = vld [vmem:[#allocation7 + $0xc4] ss:$16 sps:$4 sm:$0xff]  }
 0x143   :  { %944 = vmatprep.subr.bf16.mxu1 %v3576_v22  ;;  %v513_v22 = vld [vmem:[#allocation6 + $0x150] sm:$0xff] }
 0x144   :  { %v3578_v28 = vcombine.high %v513_v22, %v517_v23  ;;  %v3577_v34 = vcombine.low %v513_v22, %v517_v23  ;;  %v4070_v16 = vld [vmem:[#allocation7 + $0x2c4] ss:$16 sps:$4 sm:$0xff]   ;;  %v4071_v22 = vld [vmem:[#allocation7 + $0xa0] ss:$16 sps:$4 sm:$0xff]  }
 0x145   :  { %v4074_v23 = vld [vmem:[#allocation7 + $0x2a0] ss:$16 sps:$4 sm:$0xff]  }
 0x146   :  { %945 = vmatpush1.bf16.msra.mxu1 %v3575_v25  ;;  %v518_v25 = vld [vmem:[#allocation6 + $0x178] sm:$0xff] }
 0x147   :  { %946 = vmatprep.subr.bf16.mxu1 %v3568_v26  ;;  %v3585_v26 = vcombine.low %v521_v13, %v525_v14  ;;  %v3579_v35 = vcombine.low %v514_v24, %v518_v25  ;;  %v4059_v13 = vld [vmem:[#allocation7 + $0xe0] ss:$16 sps:$4 sm:$0xff]  }
 0x148   :  { %v4062_v14 = vld [vmem:[#allocation7 + $0x2e0] ss:$16 sps:$4 sm:$0xff]  }
 0x14a   :  { %947 = vmatpush1.bf16.msra.mxu1 %v3567_v29  ;;  %v3580_v29 = vcombine.high %v514_v24, %v518_v25  ;;  %v4079_v24 = vld [vmem:[#allocation7 + $0x84] ss:$16 sps:$4 sm:$0xff]  }
 0x14b   :  { %948 = vmatprep.subr.bf16.mxu1 %v3560_v30  ;;  %v505_v30 = vld [vmem:[#allocation6 + $0x110] sm:$0xff] }
 0x14c   :  { %v4082_v25 = vld [vmem:[#allocation7 + $0x284] ss:$16 sps:$4 sm:$0xff]  }
 0x14e   :  { %949 = vmatpush1.bf16.msra.mxu1 %v3559_v31  ;;  %v509_v31 = vld [vmem:[#allocation6 + $0x130] sm:$0xff] }
 0x14f   :  { %950 = vmatprep.subr.bf16.mxu1 %v3552_v39  ;;  %v3570_v36 = vcombine.high %v505_v30, %v509_v31  ;;  %v501_v39 = vld [vmem:[#allocation6 + $0xf0] sm:$0xff]  ;;  %v3569_v42 = vcombine.low %v505_v30, %v509_v31 }
 0x150   :  { %v4086_v30 = vld [vmem:[#allocation7 + $0x260] ss:$16 sps:$4 sm:$0xff]   ;;  %v4091_v31 = vld [vmem:[#allocation7 + $0x44] ss:$16 sps:$4 sm:$0xff]  }
 0x152   :  { %951 = vmatpush1.bf16.msra.mxu1 %v3551_v38  ;;  %v497_v38 = vld [vmem:[#allocation6 + $0xd0] sm:$0xff] }
 0x153   :  { %952 = vmatprep.subr.bf16.mxu1 %v3544_v47  ;;  %v3562_v44 = vcombine.high %v497_v38, %v501_v39  ;;  %v490_v47 = vld [vmem:[#allocation6 + $0x98] sm:$0xff]  ;;  %v3561_v49 = vcombine.low %v497_v38, %v501_v39  ;;  %v4098_v38 = vld [vmem:[#allocation7 + $0x220] ss:$16 sps:$4 sm:$0xff]   ;;  %v4103_v39 = vld [vmem:[#allocation7 + $0x4] ss:$16 sps:$4 sm:$0xff]  }
 0x154   :  { %v3556_v52 = vcombine.high %v490_v47, %v494_v48  ;;  %v3555_v58 = vcombine.low %v490_v47, %v494_v48  ;;  %v4118_v47 = vld [vmem:[#allocation7 + $0x3c4] ss:$16 sps:$4 sm:$0xff]   ;;  %v4113_v48 = vld [vmem:[#allocation7 + $0x1c0] ss:$16 sps:$4 sm:$0xff]  }
 0x156   :  { %953 = vmatpush1.bf16.msra.mxu1 %v3543_v46  ;;  %v493_v46 = vld [vmem:[#allocation6 + $0xb0] sm:$0xff] }
 0x157   :  { %954 = vmatprep.subr.bf16.mxu1 %v3536_v55  ;;  %v3554_v51 = vcombine.high %v489_v45, %v493_v46  ;;  %v482_v55 = vld [vmem:[#allocation6 + $0x58] sm:$0xff]  ;;  %v3553_v57 = vcombine.low %v489_v45, %v493_v46  ;;  %v4110_v45 = vld [vmem:[#allocation7 + $0x3e0] ss:$16 sps:$4 sm:$0xff]   ;;  %v4115_v46 = vld [vmem:[#allocation7 + $0x1c4] ss:$16 sps:$4 sm:$0xff]  }
 0x158   :  { %v3548_v63 = vcombine.high %v482_v55, %v486_v56 }
 0x15a   :  { %955 = vmatpush1.bf16.msra.mxu1 %v3535_v54  ;;  %v485_v54 = vld [vmem:[#allocation6 + $0x70] sm:$0xff] }
 0x15b   :  { %1026 = vmatprep.subr.bf16.mxu1 %v3596_v3  ;;  %v3546_v62 = vcombine.high %v481_v53, %v485_v54  ;;  %v474_v3 = vld [vmem:[#allocation6 + $0x18] sm:$0xff] }
 0x1fd   :  { %v3922_v4 = vpop.f32.mrf.mxu1 }
 0x1ff   :  { %v3923_v5 = vpop.f32.mrf.mxu1 }
 0x200   :  { %v3924_v6 = vadd.f32 %v3923_v5, %v3922_v4  ;;  %v478_v4 = vld [vmem:[#allocation6 + $0x38] sm:$0xff]  ;;  %v3545_v5 = vcombine.low %v481_v53, %v485_v54  ;;  %v4122_v53 = vld [vmem:[#allocation7 + $0x3a0] ss:$16 sps:$4 sm:$0xff]   ;;  %v4127_v54 = vld [vmem:[#allocation7 + $0x184] ss:$16 sps:$4 sm:$0xff]  }
 0x201   :  { %v3925_v8 = vpop.f32.mrf.mxu1 }
 0x202   :  { %v462_v10 = vadd.f32 %v3924_v6, %v3516_v7  ;;  %v3547_v6 = vcombine.low %v482_v55, %v486_v56  ;;  %v4130_v55 = vld [vmem:[#allocation7 + $0x384] ss:$16 sps:$4 sm:$0xff]   ;;  %v4125_v56 = vld [vmem:[#allocation7 + $0x180] ss:$16 sps:$4 sm:$0xff]  }
 0x203   :  { %v3926_v9 = vpop.f32.mrf.mxu1 }
 0x204   :  { %v3927_v11 = vadd.f32 %v3926_v9, %v3925_v8  ;;  %v468_v17 = vmax.f32 %v462_v10, 0.0  ;;  %v3540_v8 = vcombine.high %v474_v3, %v478_v4  ;;  %v3539_v10 = vcombine.low %v474_v3, %v478_v4  ;;  %v4142_v3 = vld [vmem:[#allocation7 + $0x344] ss:$16 sps:$4 sm:$0xff]   ;;  %v4137_v4 = vld [vmem:[#allocation7 + $0x140] ss:$16 sps:$4 sm:$0xff]  }
 0x206   :  { %v465_v12 = vadd.f32 %v3927_v11, %v3516_v7  ;;  %v4061_v11 = vld [vmem:[#allocation7 + $0xe4] ss:$16 sps:$4 sm:$0xff]  }
 0x208   :  { %v469_v18 = vmax.f32 %v465_v12, 0.0  ;;  %v4064_v12 = vld [vmem:[#allocation7 + $0x2e4] ss:$16 sps:$4 sm:$0xff]  }
 0x20a   :  { %v4755_v19 = vpack.c.bf16 %v469_v18, %v468_v17  ;;  %v4065_v17 = vld [vmem:[#allocation7 + $0xc0] ss:$16 sps:$4 sm:$0xff]  }
 0x20b   :  { %v4068_v18 = vld [vmem:[#allocation7 + $0x2c0] ss:$16 sps:$4 sm:$0xff]  }
 0x20c   :  { %930 = vmatmul.mubr.bf16.vlgmr.msra.gmra.mxu0 %v4755_v19  ;;  %973 = vmatmul.mubr.bf16.vlgmr.msra.gmra.mxu1 %v4755_v19 }
 0x20d   :  { %984 = vmatpush1.bf16.msra.mxu0 %v3593_v1  ;;  %1027 = vmatpush1.bf16.msra.mxu1 %v3595_v2  ;;  %v473_v1 = vld [vmem:[#allocation6 + $0x10] sm:$0xff] }
 0x20e   :  { %985 = vmatprep.subr.bf16.mxu0 %v3586_v20  ;;  %1028 = vmatprep.subr.bf16.mxu1 %v3588_v21  ;;  %v477_v2 = vld [vmem:[#allocation6 + $0x30] sm:$0xff] }
 0x20f   :  { %1015 = vmatprep.mubr.bf16.mxu0 %v4633_v0  ;;  %1058 = vmatprep.mubr.bf16.mxu1 %v4633_v0  ;;  %v3564_v0 = vcombine.high %v498_v40, %v502_v41  ;;  %v3538_v7 = vcombine.high %v473_v1, %v477_v2  ;;  %v3537_v9 = vcombine.low %v473_v1, %v477_v2  ;;  %v4073_v20 = vld [vmem:[#allocation7 + $0xa4] ss:$16 sps:$4 sm:$0xff]   ;;  %v4101_v41 = vld [vmem:[#allocation7] ss:$16 sps:$4 sm:$0xff]  }
 0x210   :  { %v4076_v21 = vld [vmem:[#allocation7 + $0x2a4] ss:$16 sps:$4 sm:$0xff]   ;;  %v4134_v1 = vld [vmem:[#allocation7 + $0x360] ss:$16 sps:$4 sm:$0xff]  }
 0x211   :  { %986 = vmatpush1.bf16.msra.mxu0 %v3585_v26  ;;  %1029 = vmatpush1.bf16.msra.mxu1 %v3587_v27  ;;  %v4077_v26 = vld [vmem:[#allocation7 + $0x80] ss:$16 sps:$4 sm:$0xff]   ;;  %v4085_v27 = vld [vmem:[#allocation7 + $0x64] ss:$16 sps:$4 sm:$0xff]  }
 0x212   :  { %987 = vmatprep.subr.bf16.mxu0 %v3578_v28  ;;  %1030 = vmatprep.subr.bf16.mxu1 %v3580_v29  ;;  %v4088_v28 = vld [vmem:[#allocation7 + $0x264] ss:$16 sps:$4 sm:$0xff]   ;;  %v4083_v29 = vld [vmem:[#allocation7 + $0x60] ss:$16 sps:$4 sm:$0xff]  }
 0x213   :  { %v4106_v40 = vld [vmem:[#allocation7 + $0x204] ss:$16 sps:$4 sm:$0xff]  }
 0x214   :  { %v4139_v2 = vld [vmem:[#allocation7 + $0x144] ss:$16 sps:$4 sm:$0xff]  }
 0x215   :  { %988 = vmatpush1.bf16.msra.mxu0 %v3577_v34  ;;  %1031 = vmatpush1.bf16.msra.mxu1 %v3579_v35  ;;  %v4092_v34 = vld [vmem:[#allocation7 + $0x240] ss:$16 sps:$4 sm:$0xff]   ;;  %v4097_v35 = vld [vmem:[#allocation7 + $0x24] ss:$16 sps:$4 sm:$0xff]  }
 0x216   :  { %989 = vmatprep.subr.bf16.mxu0 %v3570_v36  ;;  %1032 = vmatprep.subr.bf16.mxu1 %v3572_v37  ;;  %v4100_v36 = vld [vmem:[#allocation7 + $0x224] ss:$16 sps:$4 sm:$0xff]   ;;  %v4095_v37 = vld [vmem:[#allocation7 + $0x20] ss:$16 sps:$4 sm:$0xff]  }
 0x219   :  { %990 = vmatpush1.bf16.msra.mxu0 %v3569_v42  ;;  %1033 = vmatpush1.bf16.msra.mxu1 %v3571_v43  ;;  %v4104_v42 = vld [vmem:[#allocation7 + $0x200] ss:$16 sps:$4 sm:$0xff]   ;;  %v4109_v43 = vld [vmem:[#allocation7 + $0x1e4] ss:$16 sps:$4 sm:$0xff]  }
 0x21a   :  { %991 = vmatprep.subr.bf16.mxu0 %v3562_v44  ;;  %1034 = vmatprep.subr.bf16.mxu1 %v3564_v0  ;;  %v4112_v44 = vld [vmem:[#allocation7 + $0x3e4] ss:$16 sps:$4 sm:$0xff]   ;;  %v4107_v0 = vld [vmem:[#allocation7 + $0x1e0] ss:$16 sps:$4 sm:$0xff]  }
 0x21d   :  { %992 = vmatpush1.bf16.msra.mxu0 %v3561_v49  ;;  %1035 = vmatpush1.bf16.msra.mxu1 %v3563_v50  ;;  %v4116_v49 = vld [vmem:[#allocation7 + $0x3c0] ss:$16 sps:$4 sm:$0xff]   ;;  %v4121_v50 = vld [vmem:[#allocation7 + $0x1a4] ss:$16 sps:$4 sm:$0xff]  }
 0x21e   :  { %993 = vmatprep.subr.bf16.mxu0 %v3554_v51  ;;  %1036 = vmatprep.subr.bf16.mxu1 %v3556_v52  ;;  %v4124_v51 = vld [vmem:[#allocation7 + $0x3a4] ss:$16 sps:$4 sm:$0xff]   ;;  %v4119_v52 = vld [vmem:[#allocation7 + $0x1a0] ss:$16 sps:$4 sm:$0xff]  }
 0x221   :  { %994 = vmatpush1.bf16.msra.mxu0 %v3553_v57  ;;  %1037 = vmatpush1.bf16.msra.mxu1 %v3555_v58  ;;  %v4128_v57 = vld [vmem:[#allocation7 + $0x380] ss:$16 sps:$4 sm:$0xff]   ;;  %v4133_v58 = vld [vmem:[#allocation7 + $0x164] ss:$16 sps:$4 sm:$0xff]  }
 0x222   :  { %995 = vmatprep.subr.bf16.mxu0 %v3546_v62  ;;  %1038 = vmatprep.subr.bf16.mxu1 %v3548_v63  ;;  %v4136_v62 = vld [vmem:[#allocation7 + $0x364] ss:$16 sps:$4 sm:$0xff]   ;;  %v4131_v63 = vld [vmem:[#allocation7 + $0x160] ss:$16 sps:$4 sm:$0xff]  }
 0x225   :  { %996 = vmatpush1.bf16.msra.mxu0 %v3545_v5  ;;  %1039 = vmatpush1.bf16.msra.mxu1 %v3547_v6  ;;  %v4140_v5 = vld [vmem:[#allocation7 + $0x340] ss:$16 sps:$4 sm:$0xff]   ;;  %v4145_v6 = vld [vmem:[#allocation7 + $0x124] ss:$16 sps:$4 sm:$0xff]  }
 0x226   :  { %997 = vmatprep.subr.bf16.mxu0 %v3538_v7  ;;  %1040 = vmatprep.subr.bf16.mxu1 %v3540_v8  ;;  %v4148_v7 = vld [vmem:[#allocation7 + $0x324] ss:$16 sps:$4 sm:$0xff]   ;;  %v4143_v8 = vld [vmem:[#allocation7 + $0x120] ss:$16 sps:$4 sm:$0xff]  }
 0x229   :  { %998 = vmatpush1.bf16.msra.mxu0 %v3537_v9  ;;  %1041 = vmatpush1.bf16.msra.mxu1 %v3539_v10  ;;  %v4146_v9 = vld [vmem:[#allocation7 + $0x320] ss:$16 sps:$4 sm:$0xff]   ;;  %v4151_v10 = vld [vmem:[#allocation7 + $0x104] ss:$16 sps:$4 sm:$0xff]  }
 0x22a   :  { %2651 = vmatprep.subr.bf16.mxu0 %v4061_v11  ;;  %2694 = vmatprep.subr.bf16.mxu1 %v4064_v12  ;;  %v4154_v11 = vld [vmem:[#allocation7 + $0x304] ss:$16 sps:$4 sm:$0xff]   ;;  %v4149_v12 = vld [vmem:[#allocation7 + $0x100] ss:$16 sps:$4 sm:$0xff]  }
 0x22c   :  { %1016 = vmatmul.mubr.bf16.vlgmr.msra.gmra.mxu0 %v4755_v19  ;;  %1059 = vmatmul.mubr.bf16.vlgmr.msra.gmra.mxu1 %v4755_v19  ;;  %v4080_v19 = vld [vmem:[#allocation7 + $0x280] ss:$16 sps:$4 sm:$0xff]  }
 0x22d   :  { %2652 = vmatpush1.bf16.msra.mxu0 %v4059_v13  ;;  %2695 = vmatpush1.bf16.msra.mxu1 %v4062_v14  ;;  %v4152_v13 = vld [vmem:[#allocation7 + $0x300] ss:$16 sps:$4 sm:$0xff]   ;;  %v4157_v14 = vld [vmem:[#allocation7 + $0x4e4] ss:$16 sps:$4 sm:$0xff]  }
 0x22e   :  { %2653 = vmatprep.subr.bf16.mxu0 %v4067_v15  ;;  %2696 = vmatprep.subr.bf16.mxu1 %v4070_v16  ;;  %v4160_v15 = vld [vmem:[#allocation7 + $0x6e4] ss:$16 sps:$4 sm:$0xff]   ;;  %v551_v16 = vsub.s32 3, %v4738_v59 }
 0x231   :  { %2654 = vmatpush1.bf16.msra.mxu0 %v4065_v17  ;;  %2697 = vmatpush1.bf16.msra.mxu1 %v4068_v18  ;;  %v547_v17 = vsub.s32 2, %v4738_v59  ;;  %v4768_v18 = vld [vmem:[%s4871_s6] sm:$0xff] }
 0x232   :  { %2655 = vmatprep.subr.bf16.mxu0 %v4073_v20  ;;  %2698 = vmatprep.subr.bf16.mxu1 %v4076_v21 }
 0x235   :  { %2656 = vmatpush1.bf16.msra.mxu0 %v4071_v22  ;;  %2699 = vmatpush1.bf16.msra.mxu1 %v4074_v23  ;;  %v544_v22 = vrot.slane %v4768_v18, %v4741_v60  ;;  %v552_v23 = vrot.slane %v4768_v18, %v551_v16 }
 0x236   :  { %2657 = vmatprep.subr.bf16.mxu0 %v4079_v24  ;;  %2700 = vmatprep.subr.bf16.mxu1 %v4082_v25  ;;  %v540_v24 = vrot.slane %v4768_v18, %v4744_v61  ;;  %v548_v25 = vrot.slane %v4768_v18, %v547_v17 }
 0x239   :  { %2658 = vmatpush1.bf16.msra.mxu0 %v4077_v26  ;;  %2701 = vmatpush1.bf16.msra.mxu1 %v4080_v19 }
 0x23a   :  { %2659 = vmatprep.subr.bf16.mxu0 %v4085_v27  ;;  %2702 = vmatprep.subr.bf16.mxu1 %v4088_v28 }
 0x23d   :  { %2660 = vmatpush1.bf16.msra.mxu0 %v4083_v29  ;;  %2703 = vmatpush1.bf16.msra.mxu1 %v4086_v30 }
 0x23e   :  { %2661 = vmatprep.subr.bf16.mxu0 %v4091_v31  ;;  %2704 = vmatprep.subr.bf16.mxu1 %v4094_v32 }
 0x241   :  { %2662 = vmatpush1.bf16.msra.mxu0 %v4089_v33  ;;  %2705 = vmatpush1.bf16.msra.mxu1 %v4092_v34 }
 0x242   :  { %2663 = vmatprep.subr.bf16.mxu0 %v4097_v35  ;;  %2706 = vmatprep.subr.bf16.mxu1 %v4100_v36 }
 0x245   :  { %2664 = vmatpush1.bf16.msra.mxu0 %v4095_v37  ;;  %2707 = vmatpush1.bf16.msra.mxu1 %v4098_v38 }
 0x246   :  { %2665 = vmatprep.subr.bf16.mxu0 %v4103_v39  ;;  %2708 = vmatprep.subr.bf16.mxu1 %v4106_v40 }
 0x249   :  { %2666 = vmatpush1.bf16.msra.mxu0 %v4101_v41  ;;  %2709 = vmatpush1.bf16.msra.mxu1 %v4104_v42 }
 0x24a   :  { %2667 = vmatprep.subr.bf16.mxu0 %v4109_v43  ;;  %2710 = vmatprep.subr.bf16.mxu1 %v4112_v44 }
 0x24d   :  { %2668 = vmatpush2.bf16.msra.mxu0 %v4107_v0  ;;  %2711 = vmatpush2.bf16.msra.mxu1 %v4110_v45 }
 0x24e   :  { %2669 = vmatprep.subr.bf16.mxu0 %v4115_v46  ;;  %2712 = vmatprep.subr.bf16.mxu1 %v4118_v47 }
 0x251   :  { %2670 = vmatpush2.bf16.msra.mxu0 %v4113_v48  ;;  %2713 = vmatpush2.bf16.msra.mxu1 %v4116_v49  ;;  %v4155_v48 = vld [vmem:[#allocation7 + $0x4e0] ss:$16 sps:$4 sm:$0xff]  }
 0x252   :  { %2671 = vmatprep.subr.bf16.mxu0 %v4121_v50  ;;  %2714 = vmatprep.subr.bf16.mxu1 %v4124_v51  ;;  %v4158_v49 = vld [vmem:[#allocation7 + $0x6e0] ss:$16 sps:$4 sm:$0xff]  }
 0x255   :  { %2672 = vmatpush2.bf16.msra.mxu0 %v4119_v52  ;;  %2715 = vmatpush2.bf16.msra.mxu1 %v4122_v53  ;;  %v4163_v52 = vld [vmem:[#allocation7 + $0x4c4] ss:$16 sps:$4 sm:$0xff]  }
 0x256   :  { %2673 = vmatprep.subr.bf16.mxu0 %v4127_v54  ;;  %2716 = vmatprep.subr.bf16.mxu1 %v4130_v55  ;;  %v4166_v53 = vld [vmem:[#allocation7 + $0x6c4] ss:$16 sps:$4 sm:$0xff]   ;;  %v4161_v54 = vld [vmem:[#allocation7 + $0x4c0] ss:$16 sps:$4 sm:$0xff]  }
 0x257   :  { %v4164_v55 = vld [vmem:[#allocation7 + $0x6c0] ss:$16 sps:$4 sm:$0xff]  }
 0x259   :  { %2674 = vmatpush2.bf16.msra.mxu0 %v4125_v56  ;;  %2717 = vmatpush2.bf16.msra.mxu1 %v4128_v57  ;;  %v4169_v56 = vld [vmem:[#allocation7 + $0x4a4] ss:$16 sps:$4 sm:$0xff]  }
 0x25a   :  { %2675 = vmatprep.subr.bf16.mxu0 %v4133_v58  ;;  %2718 = vmatprep.subr.bf16.mxu1 %v4136_v62  ;;  %v4172_v57 = vld [vmem:[#allocation7 + $0x6a4] ss:$16 sps:$4 sm:$0xff]   ;;  %v4167_v58 = vld [vmem:[#allocation7 + $0x4a0] ss:$16 sps:$4 sm:$0xff]  }
 0x25b   :  { %v4170_v62 = vld [vmem:[#allocation7 + $0x6a0] ss:$16 sps:$4 sm:$0xff]  }
 0x25d   :  { %2676 = vmatpush2.bf16.msra.mxu0 %v4131_v63  ;;  %2719 = vmatpush2.bf16.msra.mxu1 %v4134_v1  ;;  %v4175_v63 = vld [vmem:[#allocation7 + $0x484] ss:$16 sps:$4 sm:$0xff]  }
 0x25e   :  { %2677 = vmatprep.subr.bf16.mxu0 %v4139_v2  ;;  %2720 = vmatprep.subr.bf16.mxu1 %v4142_v3  ;;  %v4178_v1 = vld [vmem:[#allocation7 + $0x684] ss:$16 sps:$4 sm:$0xff]   ;;  %v4173_v2 = vld [vmem:[#allocation7 + $0x480] ss:$16 sps:$4 sm:$0xff]  }
 0x25f   :  { %v4176_v3 = vld [vmem:[#allocation7 + $0x680] ss:$16 sps:$4 sm:$0xff]  }
 0x261   :  { %2678 = vmatpush2.bf16.msra.mxu0 %v4137_v4  ;;  %2721 = vmatpush2.bf16.msra.mxu1 %v4140_v5  ;;  %v4181_v4 = vld [vmem:[#allocation7 + $0x464] ss:$16 sps:$4 sm:$0xff]  }
 0x262   :  { %2679 = vmatprep.subr.bf16.mxu0 %v4145_v6  ;;  %2722 = vmatprep.subr.bf16.mxu1 %v4148_v7  ;;  %v4184_v5 = vld [vmem:[#allocation7 + $0x664] ss:$16 sps:$4 sm:$0xff]   ;;  %v4179_v6 = vld [vmem:[#allocation7 + $0x460] ss:$16 sps:$4 sm:$0xff]  }
 0x263   :  { %v4182_v7 = vld [vmem:[#allocation7 + $0x660] ss:$16 sps:$4 sm:$0xff]  }
 0x265   :  { %2680 = vmatpush2.bf16.msra.mxu0 %v4143_v8  ;;  %2723 = vmatpush2.bf16.msra.mxu1 %v4146_v9  ;;  %v4187_v8 = vld [vmem:[#allocation7 + $0x444] ss:$16 sps:$4 sm:$0xff]  }
 0x266   :  { %2681 = vmatprep.subr.bf16.mxu0 %v4151_v10  ;;  %2724 = vmatprep.subr.bf16.mxu1 %v4154_v11  ;;  %v4190_v9 = vld [vmem:[#allocation7 + $0x644] ss:$16 sps:$4 sm:$0xff]   ;;  %v559_v10 = vsub.s32 5, %v4738_v59  ;;  %v567_v11 = vsub.s32 7, %v4738_v59 }
 0x269   :  { %2682 = vmatpush2.bf16.msra.mxu0 %v4149_v12  ;;  %2725 = vmatpush2.bf16.msra.mxu1 %v4152_v13  ;;  %v4185_v12 = vld [vmem:[#allocation7 + $0x440] ss:$16 sps:$4 sm:$0xff]  }
 0x26a   :  { %2737 = vmatprep.subr.bf16.mxu0 %v4157_v14  ;;  %2780 = vmatprep.subr.bf16.mxu1 %v4160_v15  ;;  %v4188_v13 = vld [vmem:[#allocation7 + $0x640] ss:$16 sps:$4 sm:$0xff]  }
 0x2cc   :  { %v931_v20 = vpop.f32.mrf.mxu0  ;;  %v974_v21 = vpop.f32.mrf.mxu1 }
 0x2cd   :  { %v932_v33 = vadd.f32 %v931_v20, %v540_v24  ;;  %v975_v34 = vadd.f32 %v974_v21, %v548_v25  ;;  %v4193_v20 = vld [vmem:[#allocation7 + $0x424] ss:$16 sps:$4 sm:$0xff]  }
 0x2ce   :  { %v933_v26 = vpop.f32.mrf.mxu0  ;;  %v976_v19 = vpop.f32.mrf.mxu1  ;;  %v4196_v21 = vld [vmem:[#allocation7 + $0x624] ss:$16 sps:$4 sm:$0xff]  }
 0x2cf   :  { %v934_v29 = vadd.f32 %v933_v26, %v544_v22  ;;  %v977_v30 = vadd.f32 %v976_v19, %v552_v23  ;;  %v1069_v0 = vmax.f32 %v932_v33, 0.0  ;;  %v1071_v45 = vmax.f32 %v975_v34, 0.0  ;;  %v4191_v26 = vld [vmem:[#allocation7 + $0x420] ss:$16 sps:$4 sm:$0xff]  }
 0x2d0   :  { %v935_v27 = vpop.f32.mrf.mxu0  ;;  %v978_v28 = vpop.f32.mrf.mxu1  ;;  %v4194_v19 = vld [vmem:[#allocation7 + $0x620] ss:$16 sps:$4 sm:$0xff]  }
 0x2d1   :  { %v936_v31 = vadd.f32 %v935_v27, %v540_v24  ;;  %v979_v32 = vadd.f32 %v978_v28, %v548_v25  ;;  %v1070_v41 = vmax.f32 %v934_v29, 0.0  ;;  %v1072_v42 = vmax.f32 %v977_v30, 0.0  ;;  %v4199_v29 = vld [vmem:[#allocation7 + $0x404] ss:$16 sps:$4 sm:$0xff]  }
 0x2d2   :  { %v937_v35 = vpop.f32.mrf.mxu0  ;;  %v980_v36 = vpop.f32.mrf.mxu1  ;;  %v4202_v30 = vld [vmem:[#allocation7 + $0x604] ss:$16 sps:$4 sm:$0xff]  }
 0x2d3   :  { %v938_v37 = vadd.f32 %v937_v35, %v544_v22  ;;  %v981_v38 = vadd.f32 %v980_v36, %v552_v23  ;;  %v1077_v39 = vmax.f32 %v936_v31, 0.0  ;;  %v1079_v40 = vmax.f32 %v979_v32, 0.0 }
 0x2d4   :  { %v560_v22 = vrot.slane %v4768_v18, %v559_v10  ;;  %v568_v23 = vrot.slane %v4768_v18, %v567_v11  ;;  %v555_v10 = vsub.s32 4, %v4738_v59  ;;  %v563_v11 = vsub.s32 6, %v4738_v59 }
 0x2d5   :  { %v1078_v43 = vmax.f32 %v938_v37, 0.0  ;;  %v1080_v44 = vmax.f32 %v981_v38, 0.0  ;;  %v4784_v50 = vpack.c.bf16 %v1077_v39, %v1069_v0  ;;  %v4786_v51 = vpack.c.bf16 %v1079_v40, %v1071_v45  ;;  %v4197_v37 = vld [vmem:[#allocation7 + $0x400] ss:$16 sps:$4 sm:$0xff]   ;;  %v4205_v39 = vld [vmem:[#allocation7 + $0x5e4] ss:$16 sps:$4 sm:$0xff]  }
 0x2d6   :  { %v4200_v38 = vld [vmem:[#allocation7 + $0x600] ss:$16 sps:$4 sm:$0xff]   ;;  %v4208_v40 = vld [vmem:[#allocation7 + $0x7e4] ss:$16 sps:$4 sm:$0xff]  }
 0x2d7   :  { %v4780_v46 = vpack.c.bf16 %v1078_v43, %v1070_v41  ;;  %v4782_v47 = vpack.c.bf16 %v1080_v44, %v1072_v42 }
 0x2d9   :  { %2683 = vmatprep.mubr.bf16.mxu0 %v4780_v46  ;;  %2726 = vmatprep.mubr.bf16.mxu1 %v4782_v47 }
 0x2da   :  { %2684 = vmatmul.mubr.bf16.vlgmr.msra.gmra.mxu0 %v4784_v50  ;;  %2727 = vmatmul.mubr.bf16.vlgmr.msra.gmra.mxu1 %v4786_v51 }
 0x2db   :  { %2738 = vmatpush1.bf16.msra.mxu0 %v4155_v48  ;;  %2781 = vmatpush1.bf16.msra.mxu1 %v4158_v49  ;;  %v4203_v48 = vld [vmem:[#allocation7 + $0x5e0] ss:$16 sps:$4 sm:$0xff]  }
 0x2dc   :  { %2739 = vmatprep.subr.bf16.mxu0 %v4163_v52  ;;  %2782 = vmatprep.subr.bf16.mxu1 %v4166_v53  ;;  %v4206_v49 = vld [vmem:[#allocation7 + $0x7e0] ss:$16 sps:$4 sm:$0xff]   ;;  %v4211_v52 = vld [vmem:[#allocation7 + $0x5c4] ss:$16 sps:$4 sm:$0xff]  }
 0x2dd   :  { %v4214_v53 = vld [vmem:[#allocation7 + $0x7c4] ss:$16 sps:$4 sm:$0xff]  }
 0x2df   :  { %2740 = vmatpush1.bf16.msra.mxu0 %v4161_v54  ;;  %2783 = vmatpush1.bf16.msra.mxu1 %v4164_v55  ;;  %v4209_v54 = vld [vmem:[#allocation7 + $0x5c0] ss:$16 sps:$4 sm:$0xff]  }
 0x2e0   :  { %2741 = vmatprep.subr.bf16.mxu0 %v4169_v56  ;;  %2784 = vmatprep.subr.bf16.mxu1 %v4172_v57  ;;  %v4212_v55 = vld [vmem:[#allocation7 + $0x7c0] ss:$16 sps:$4 sm:$0xff]   ;;  %v4217_v56 = vld [vmem:[#allocation7 + $0x5a4] ss:$16 sps:$4 sm:$0xff]  }
 0x2e1   :  { %v4220_v57 = vld [vmem:[#allocation7 + $0x7a4] ss:$16 sps:$4 sm:$0xff]  }
 0x2e3   :  { %2742 = vmatpush1.bf16.msra.mxu0 %v4167_v58  ;;  %2785 = vmatpush1.bf16.msra.mxu1 %v4170_v62  ;;  %v4215_v58 = vld [vmem:[#allocation7 + $0x5a0] ss:$16 sps:$4 sm:$0xff]  }
 0x2e4   :  { %2743 = vmatprep.subr.bf16.mxu0 %v4175_v63  ;;  %2786 = vmatprep.subr.bf16.mxu1 %v4178_v1  ;;  %v4218_v62 = vld [vmem:[#allocation7 + $0x7a0] ss:$16 sps:$4 sm:$0xff]   ;;  %v4223_v63 = vld [vmem:[#allocation7 + $0x584] ss:$16 sps:$4 sm:$0xff]  }
 0x2e5   :  { %v4226_v1 = vld [vmem:[#allocation7 + $0x784] ss:$16 sps:$4 sm:$0xff]  }
 0x2e7   :  { %2744 = vmatpush1.bf16.msra.mxu0 %v4173_v2  ;;  %2787 = vmatpush1.bf16.msra.mxu1 %v4176_v3  ;;  %v4221_v2 = vld [vmem:[#allocation7 + $0x580] ss:$16 sps:$4 sm:$0xff]  }
 0x2e8   :  { %2745 = vmatprep.subr.bf16.mxu0 %v4181_v4  ;;  %2788 = vmatprep.subr.bf16.mxu1 %v4184_v5  ;;  %v4224_v3 = vld [vmem:[#allocation7 + $0x780] ss:$16 sps:$4 sm:$0xff]   ;;  %v4229_v4 = vld [vmem:[#allocation7 + $0x564] ss:$16 sps:$4 sm:$0xff]  }
 0x2e9   :  { %v4232_v5 = vld [vmem:[#allocation7 + $0x764] ss:$16 sps:$4 sm:$0xff]  }
 0x2eb   :  { %2746 = vmatpush1.bf16.msra.mxu0 %v4179_v6  ;;  %2789 = vmatpush1.bf16.msra.mxu1 %v4182_v7  ;;  %v4227_v6 = vld [vmem:[#allocation7 + $0x560] ss:$16 sps:$4 sm:$0xff]  }
 0x2ec   :  { %v4794_v14 = vpop.f32.mrf.mxu0  ;;  %v4796_v15 = vpop.f32.mrf.mxu1  ;;  %2747 = vmatprep.subr.bf16.mxu0 %v4187_v8  ;;  %2790 = vmatprep.subr.bf16.mxu1 %v4190_v9  ;;  %v4230_v7 = vld [vmem:[#allocation7 + $0x760] ss:$16 sps:$4 sm:$0xff]   ;;  %v4235_v8 = vld [vmem:[#allocation7 + $0x544] ss:$16 sps:$4 sm:$0xff]  }
 0x2ed   :  { %v4238_v9 = vld [vmem:[#allocation7 + $0x744] ss:$16 sps:$4 sm:$0xff]  }
 0x2ee   :  { %v1019_v24 = vpop.f32.mrf.mxu0  ;;  %v1062_v25 = vpop.f32.mrf.mxu1 }
 0x2ef   :  { %2748 = vmatpush1.bf16.msra.mxu0 %v4185_v12  ;;  %2791 = vmatpush1.bf16.msra.mxu1 %v4188_v13  ;;  %v1020_v31 = vadd.f32 %v1019_v24, %v560_v22  ;;  %v1063_v32 = vadd.f32 %v1062_v25, %v568_v23  ;;  %v4233_v12 = vld [vmem:[#allocation7 + $0x540] ss:$16 sps:$4 sm:$0xff]  }
 0x2f0   :  { %v4800_v27 = vpop.f32.mrf.mxu0  ;;  %v4802_v28 = vpop.f32.mrf.mxu1  ;;  %2749 = vmatprep.subr.bf16.mxu0 %v4193_v20  ;;  %2792 = vmatprep.subr.bf16.mxu1 %v4196_v21  ;;  %v4236_v13 = vld [vmem:[#allocation7 + $0x740] ss:$16 sps:$4 sm:$0xff]   ;;  %v4241_v20 = vld [vmem:[#allocation7 + $0x524] ss:$16 sps:$4 sm:$0xff]  }
 0x2f1   :  { %v1074_v41 = vmax.f32 %v1020_v31, 0.0  ;;  %v1076_v42 = vmax.f32 %v1063_v32, 0.0  ;;  %v4244_v21 = vld [vmem:[#allocation7 + $0x724] ss:$16 sps:$4 sm:$0xff]   ;;  %v4239_v24 = vld [vmem:[#allocation7 + $0x520] ss:$16 sps:$4 sm:$0xff]  }
 0x2f2   :  { %v1023_v33 = vpop.f32.mrf.mxu0  ;;  %v1066_v34 = vpop.f32.mrf.mxu1  ;;  %v4242_v25 = vld [vmem:[#allocation7 + $0x720] ss:$16 sps:$4 sm:$0xff]  }
 0x2f3   :  { %v1024_v35 = vadd.f32 %v1023_v33, %v560_v22  ;;  %v1067_v36 = vadd.f32 %v1066_v34, %v568_v23  ;;  %2750 = vmatpush1.bf16.msra.mxu0 %v4191_v26  ;;  %2793 = vmatpush1.bf16.msra.mxu1 %v4194_v19  ;;  %v556_v22 = vrot.slane %v4768_v18, %v555_v10  ;;  %v4245_v33 = vld [vmem:[#allocation7 + $0x500] ss:$16 sps:$4 sm:$0xff]   ;;  %v4296_v10 = vld [vmem:[#allocation7 + $0x208] ss:$16 sps:$4 sm:$0xff]  }
 0x2f4   :  { %2751 = vmatprep.subr.bf16.mxu0 %v4199_v29  ;;  %2794 = vmatprep.subr.bf16.mxu1 %v4202_v30  ;;  %v564_v23 = vrot.slane %v4768_v18, %v563_v11  ;;  %v4247_v29 = vld [vmem:[#allocation7 + $0x504] ss:$16 sps:$4 sm:$0xff]   ;;  %v4248_v18 = vld [vmem:[#allocation7 + $0x700] ss:$16 sps:$4 sm:$0xff]   ;;  %v4301_v11 = vld [vmem:[#allocation7 + $0x1ec] ss:$16 sps:$4 sm:$0xff]  }
 0x2f5   :  { %v1082_v43 = vmax.f32 %v1024_v35, 0.0  ;;  %v1084_v44 = vmax.f32 %v1067_v36, 0.0  ;;  %v1022_v26 = vadd.f32 %v4800_v27, %v556_v22  ;;  %v4250_v30 = vld [vmem:[#allocation7 + $0x704] ss:$16 sps:$4 sm:$0xff]   ;;  %v1018_v31 = vadd.f32 %v4794_v14, %v556_v22  ;;  %v4253_v36 = vld [vmem:[#allocation7 + $0xec] ss:$16 sps:$4 sm:$0xff]  }
 0x2f6   :  { %v1065_v19 = vadd.f32 %v4802_v28, %v564_v23  ;;  %v1061_v32 = vadd.f32 %v4796_v15, %v564_v23  ;;  %v4256_v27 = vld [vmem:[#allocation7 + $0x2ec] ss:$16 sps:$4 sm:$0xff]   ;;  %v4254_v15 = vld [vmem:[#allocation7 + $0x2e8] ss:$16 sps:$4 sm:$0xff]  }
 0x2f7   :  { %v4804_v0 = vpack.c.bf16 %v1082_v43, %v1074_v41  ;;  %v4806_v45 = vpack.c.bf16 %v1084_v44, %v1076_v42  ;;  %2752 = vmatpush1.bf16.msra.mxu0 %v4197_v37  ;;  %2795 = vmatpush1.bf16.msra.mxu1 %v4200_v38  ;;  %v1081_v34 = vmax.f32 %v1022_v26, 0.0  ;;  %v1073_v37 = vmax.f32 %v1018_v31, 0.0  ;;  %v4251_v38 = vld [vmem:[#allocation7 + $0xe8] ss:$16 sps:$4 sm:$0xff]   ;;  %v4262_v41 = vld [vmem:[#allocation7 + $0x2cc] ss:$16 sps:$4 sm:$0xff]  }
 0x2f8   :  { %2753 = vmatprep.subr.bf16.mxu0 %v4205_v39  ;;  %2796 = vmatprep.subr.bf16.mxu1 %v4208_v40  ;;  %v1083_v35 = vmax.f32 %v1065_v19, 0.0  ;;  %v1075_v28 = vmax.f32 %v1061_v32, 0.0  ;;  %v4259_v40 = vld [vmem:[#allocation7 + $0xcc] ss:$16 sps:$4 sm:$0xff]   ;;  %v4257_v42 = vld [vmem:[#allocation7 + $0xc8] ss:$16 sps:$4 sm:$0xff]  }
 0x2f9   :  { %2769 = vmatprep.mubr.bf16.mxu0 %v4804_v0  ;;  %2812 = vmatprep.mubr.bf16.mxu1 %v4806_v45  ;;  %v4818_v39 = vpack.c.bf16 %v1081_v34, %v1073_v37  ;;  %v4260_v43 = vld [vmem:[#allocation7 + $0x2c8] ss:$16 sps:$4 sm:$0xff]   ;;  %v4265_v44 = vld [vmem:[#allocation7 + $0xac] ss:$16 sps:$4 sm:$0xff]  }
 0x2fa   :  { %v4820_v14 = vpack.c.bf16 %v1083_v35, %v1075_v28  ;;  %v4310_v22 = vld [vmem:[#allocation7 + $0x3cc] ss:$16 sps:$4 sm:$0xff]   ;;  %v4305_v23 = vld [vmem:[#allocation7 + $0x1c8] ss:$16 sps:$4 sm:$0xff]  }
 0x2fb   :  { %2754 = vmatpush2.bf16.msra.mxu0 %v4203_v48  ;;  %2797 = vmatpush2.bf16.msra.mxu1 %v4206_v49  ;;  %v4268_v48 = vld [vmem:[#allocation7 + $0x2ac] ss:$16 sps:$4 sm:$0xff]   ;;  %v4263_v49 = vld [vmem:[#allocation7 + $0xa8] ss:$16 sps:$4 sm:$0xff]  }
 0x2fc   :  { %2755 = vmatprep.subr.bf16.mxu0 %v4211_v52  ;;  %2798 = vmatprep.subr.bf16.mxu1 %v4214_v53  ;;  %v4266_v52 = vld [vmem:[#allocation7 + $0x2a8] ss:$16 sps:$4 sm:$0xff]   ;;  %v4271_v53 = vld [vmem:[#allocation7 + $0x8c] ss:$16 sps:$4 sm:$0xff]  }
 0x2fd   :  { %v4316_v26 = vld [vmem:[#allocation7 + $0x3ac] ss:$16 sps:$4 sm:$0xff]   ;;  %v4311_v19 = vld [vmem:[#allocation7 + $0x1a8] ss:$16 sps:$4 sm:$0xff]  }
 0x2fe   :  { %v4322_v31 = vld [vmem:[#allocation7 + $0x38c] ss:$16 sps:$4 sm:$0xff]   ;;  %v4317_v32 = vld [vmem:[#allocation7 + $0x188] ss:$16 sps:$4 sm:$0xff]  }
 0x2ff   :  { %2756 = vmatpush2.bf16.msra.mxu0 %v4209_v54  ;;  %2799 = vmatpush2.bf16.msra.mxu1 %v4212_v55  ;;  %v4274_v54 = vld [vmem:[#allocation7 + $0x28c] ss:$16 sps:$4 sm:$0xff]   ;;  %v4269_v55 = vld [vmem:[#allocation7 + $0x88] ss:$16 sps:$4 sm:$0xff]  }
 0x300   :  { %2757 = vmatprep.subr.bf16.mxu0 %v4217_v56  ;;  %2800 = vmatprep.subr.bf16.mxu1 %v4220_v57  ;;  %v4277_v56 = vld [vmem:[#allocation7 + $0x6c] ss:$16 sps:$4 sm:$0xff]   ;;  %v4275_v57 = vld [vmem:[#allocation7 + $0x68] ss:$16 sps:$4 sm:$0xff]  }
 0x301   :  { %v4328_v34 = vld [vmem:[#allocation7 + $0x36c] ss:$16 sps:$4 sm:$0xff]   ;;  %v4323_v35 = vld [vmem:[#allocation7 + $0x168] ss:$16 sps:$4 sm:$0xff]  }
 0x302   :  { %v4334_v37 = vld [vmem:[#allocation7 + $0x34c] ss:$16 sps:$4 sm:$0xff]   ;;  %v4329_v28 = vld [vmem:[#allocation7 + $0x148] ss:$16 sps:$4 sm:$0xff]  }
 0x303   :  { %2758 = vmatpush2.bf16.msra.mxu0 %v4215_v58  ;;  %2801 = vmatpush2.bf16.msra.mxu1 %v4218_v62  ;;  %v4278_v58 = vld [vmem:[#allocation7 + $0x268] ss:$16 sps:$4 sm:$0xff]   ;;  %v4283_v62 = vld [vmem:[#allocation7 + $0x4c] ss:$16 sps:$4 sm:$0xff]  }
 0x304   :  { %2759 = vmatprep.subr.bf16.mxu0 %v4223_v63  ;;  %2802 = vmatprep.subr.bf16.mxu1 %v4226_v1  ;;  %v4286_v63 = vld [vmem:[#allocation7 + $0x24c] ss:$16 sps:$4 sm:$0xff]   ;;  %v4281_v1 = vld [vmem:[#allocation7 + $0x48] ss:$16 sps:$4 sm:$0xff]  }
 0x307   :  { %2760 = vmatpush2.bf16.msra.mxu0 %v4221_v2  ;;  %2803 = vmatpush2.bf16.msra.mxu1 %v4224_v3  ;;  %v4284_v2 = vld [vmem:[#allocation7 + $0x248] ss:$16 sps:$4 sm:$0xff]   ;;  %v4289_v3 = vld [vmem:[#allocation7 + $0x2c] ss:$16 sps:$4 sm:$0xff]  }
 0x308   :  { %2761 = vmatprep.subr.bf16.mxu0 %v4229_v4  ;;  %2804 = vmatprep.subr.bf16.mxu1 %v4232_v5  ;;  %v4292_v4 = vld [vmem:[#allocation7 + $0x22c] ss:$16 sps:$4 sm:$0xff]   ;;  %v4287_v5 = vld [vmem:[#allocation7 + $0x28] ss:$16 sps:$4 sm:$0xff]  }
 0x30b   :  { %2762 = vmatpush2.bf16.msra.mxu0 %v4227_v6  ;;  %2805 = vmatpush2.bf16.msra.mxu1 %v4230_v7  ;;  %v4290_v6 = vld [vmem:[#allocation7 + $0x228] ss:$16 sps:$4 sm:$0xff]   ;;  %v4295_v7 = vld [vmem:[#allocation7 + $0xc] ss:$16 sps:$4 sm:$0xff]  }
 0x30c   :  { %2763 = vmatprep.subr.bf16.mxu0 %v4235_v8  ;;  %2806 = vmatprep.subr.bf16.mxu1 %v4238_v9  ;;  %v4298_v8 = vld [vmem:[#allocation7 + $0x20c] ss:$16 sps:$4 sm:$0xff]   ;;  %v4293_v9 = vld [vmem:[#allocation7 + $0x8] ss:$16 sps:$4 sm:$0xff]  }
 0x30f   :  { %2764 = vmatpush2.bf16.msra.mxu0 %v4233_v12  ;;  %2807 = vmatpush2.bf16.msra.mxu1 %v4236_v13  ;;  %v4304_v12 = vld [vmem:[#allocation7 + $0x3ec] ss:$16 sps:$4 sm:$0xff]   ;;  %v4299_v13 = vld [vmem:[#allocation7 + $0x1e8] ss:$16 sps:$4 sm:$0xff]  }
 0x310   :  { %2765 = vmatprep.subr.bf16.mxu0 %v4241_v20  ;;  %2808 = vmatprep.subr.bf16.mxu1 %v4244_v21  ;;  %v4302_v20 = vld [vmem:[#allocation7 + $0x3e8] ss:$16 sps:$4 sm:$0xff]   ;;  %v4307_v21 = vld [vmem:[#allocation7 + $0x1cc] ss:$16 sps:$4 sm:$0xff]  }
 0x313   :  { %2766 = vmatpush2.bf16.msra.mxu0 %v4239_v24  ;;  %2809 = vmatpush2.bf16.msra.mxu1 %v4242_v25  ;;  %v4308_v24 = vld [vmem:[#allocation7 + $0x3c8] ss:$16 sps:$4 sm:$0xff]   ;;  %v4313_v25 = vld [vmem:[#allocation7 + $0x1ac] ss:$16 sps:$4 sm:$0xff]  }
 0x314   :  { %2767 = vmatprep.subr.bf16.mxu0 %v4247_v29  ;;  %2810 = vmatprep.subr.bf16.mxu1 %v4250_v30  ;;  %v4314_v29 = vld [vmem:[#allocation7 + $0x3a8] ss:$16 sps:$4 sm:$0xff]   ;;  %v4319_v30 = vld [vmem:[#allocation7 + $0x18c] ss:$16 sps:$4 sm:$0xff]  }
 0x317   :  { %2768 = vmatpush2.bf16.msra.mxu0 %v4245_v33  ;;  %2811 = vmatpush2.bf16.msra.mxu1 %v4248_v18  ;;  %v4320_v33 = vld [vmem:[#allocation7 + $0x388] ss:$16 sps:$4 sm:$0xff]   ;;  %v4325_v18 = vld [vmem:[#allocation7 + $0x16c] ss:$16 sps:$4 sm:$0xff]  }
 0x318   :  { %2823 = vmatprep.subr.bf16.mxu0 %v4253_v36  ;;  %2866 = vmatprep.subr.bf16.mxu1 %v4256_v27  ;;  %v4326_v36 = vld [vmem:[#allocation7 + $0x368] ss:$16 sps:$4 sm:$0xff]   ;;  %v4331_v27 = vld [vmem:[#allocation7 + $0x14c] ss:$16 sps:$4 sm:$0xff]  }
 0x31a   :  { %2770 = vmatmul.mubr.bf16.vlgmr.msra.gmra.mxu0 %v4818_v39  ;;  %2813 = vmatmul.mubr.bf16.vlgmr.msra.gmra.mxu1 %v4820_v14 }
 0x31b   :  { %2824 = vmatpush1.bf16.msra.mxu0 %v4251_v38  ;;  %2855 = vmatprep.mubr.bf16.mxu0 %v4780_v46  ;;  %v4272_v46 = vld [vmem:[#allocation7 + $0x288] ss:$16 sps:$4 sm:$0xff]  }
 0x31c   :  { %2867 = vmatpush1.bf16.msra.mxu1 %v4254_v15  ;;  %2898 = vmatprep.mubr.bf16.mxu1 %v4782_v47  ;;  %v4280_v47 = vld [vmem:[#allocation7 + $0x26c] ss:$16 sps:$4 sm:$0xff]   ;;  %v4332_v38 = vld [vmem:[#allocation7 + $0x348] ss:$16 sps:$4 sm:$0xff]  }
 0x31d   :  { %2825 = vmatprep.subr.bf16.mxu0 %v4259_v40  ;;  %2868 = vmatprep.subr.bf16.mxu1 %v4262_v41  ;;  %v4337_v15 = vld [vmem:[#allocation7 + $0x12c] ss:$16 sps:$4 sm:$0xff]   ;;  %v4335_v41 = vld [vmem:[#allocation7 + $0x128] ss:$16 sps:$4 sm:$0xff]  }
 0x31e   :  { %v4340_v40 = vld [vmem:[#allocation7 + $0x32c] ss:$16 sps:$4 sm:$0xff]  }
 0x31f   :  { %2826 = vmatpush1.bf16.msra.mxu0 %v4257_v42  ;;  %v4338_v42 = vld [vmem:[#allocation7 + $0x328] ss:$16 sps:$4 sm:$0xff]  }
 0x320   :  { %2869 = vmatpush1.bf16.msra.mxu1 %v4260_v43  ;;  %2827 = vmatprep.subr.bf16.mxu0 %v4265_v44  ;;  %v4343_v43 = vld [vmem:[#allocation7 + $0x10c] ss:$16 sps:$4 sm:$0xff]  }
 0x321   :  { %2870 = vmatprep.subr.bf16.mxu1 %v4268_v48  ;;  %v4346_v44 = vld [vmem:[#allocation7 + $0x30c] ss:$16 sps:$4 sm:$0xff]   ;;  %v4341_v48 = vld [vmem:[#allocation7 + $0x108] ss:$16 sps:$4 sm:$0xff]  }
 0x323   :  { %2828 = vmatpush1.bf16.msra.mxu0 %v4263_v49  ;;  %v4344_v49 = vld [vmem:[#allocation7 + $0x308] ss:$16 sps:$4 sm:$0xff]  }
 0x324   :  { %2871 = vmatpush1.bf16.msra.mxu1 %v4266_v52  ;;  %2829 = vmatprep.subr.bf16.mxu0 %v4271_v53  ;;  %v4349_v52 = vld [vmem:[#allocation7 + $0x4ec] ss:$16 sps:$4 sm:$0xff]  }
 0x325   :  { %2872 = vmatprep.subr.bf16.mxu1 %v4274_v54  ;;  %v4352_v53 = vld [vmem:[#allocation7 + $0x6ec] ss:$16 sps:$4 sm:$0xff]   ;;  %v4347_v54 = vld [vmem:[#allocation7 + $0x4e8] ss:$16 sps:$4 sm:$0xff]  }
 0x327   :  { %2830 = vmatpush1.bf16.msra.mxu0 %v4269_v55  ;;  %v4350_v55 = vld [vmem:[#allocation7 + $0x6e8] ss:$16 sps:$4 sm:$0xff]  }
 0x328   :  { %2873 = vmatpush1.bf16.msra.mxu1 %v4272_v46  ;;  %2831 = vmatprep.subr.bf16.mxu0 %v4277_v56  ;;  %v4355_v46 = vld [vmem:[#allocation7 + $0x4cc] ss:$16 sps:$4 sm:$0xff]  }
 0x329   :  { %2874 = vmatprep.subr.bf16.mxu1 %v4280_v47  ;;  %v4358_v56 = vld [vmem:[#allocation7 + $0x6cc] ss:$16 sps:$4 sm:$0xff]   ;;  %v4353_v47 = vld [vmem:[#allocation7 + $0x4c8] ss:$16 sps:$4 sm:$0xff]  }
 0x32b   :  { %2832 = vmatpush1.bf16.msra.mxu0 %v4275_v57  ;;  %v4356_v57 = vld [vmem:[#allocation7 + $0x6c8] ss:$16 sps:$4 sm:$0xff]  }
 0x32c   :  { %2875 = vmatpush1.bf16.msra.mxu1 %v4278_v58  ;;  %2833 = vmatprep.subr.bf16.mxu0 %v4283_v62  ;;  %v4361_v58 = vld [vmem:[#allocation7 + $0x4ac] ss:$16 sps:$4 sm:$0xff]  }
 0x32d   :  { %2876 = vmatprep.subr.bf16.mxu1 %v4286_v63  ;;  %v4364_v62 = vld [vmem:[#allocation7 + $0x6ac] ss:$16 sps:$4 sm:$0xff]   ;;  %v4359_v63 = vld [vmem:[#allocation7 + $0x4a8] ss:$16 sps:$4 sm:$0xff]  }
 0x32f   :  { %2834 = vmatpush1.bf16.msra.mxu0 %v4281_v1  ;;  %v4367_v1 = vld [vmem:[#allocation7 + $0x48c] ss:$16 sps:$4 sm:$0xff]  }
 0x330   :  { %2877 = vmatpush1.bf16.msra.mxu1 %v4284_v2  ;;  %2835 = vmatprep.subr.bf16.mxu0 %v4289_v3  ;;  %v4365_v2 = vld [vmem:[#allocation7 + $0x488] ss:$16 sps:$4 sm:$0xff]   ;;  %v4373_v3 = vld [vmem:[#allocation7 + $0x46c] ss:$16 sps:$4 sm:$0xff]  }
 0x331   :  { %2878 = vmatprep.subr.bf16.mxu1 %v4292_v4  ;;  %v4376_v4 = vld [vmem:[#allocation7 + $0x66c] ss:$16 sps:$4 sm:$0xff]  }
 0x333   :  { %2836 = vmatpush1.bf16.msra.mxu0 %v4287_v5  ;;  %v4374_v5 = vld [vmem:[#allocation7 + $0x668] ss:$16 sps:$4 sm:$0xff]  }
 0x334   :  { %2879 = vmatpush1.bf16.msra.mxu1 %v4290_v6  ;;  %2837 = vmatprep.subr.bf16.mxu0 %v4295_v7  ;;  %v4379_v6 = vld [vmem:[#allocation7 + $0x44c] ss:$16 sps:$4 sm:$0xff]  }
 0x335   :  { %2880 = vmatprep.subr.bf16.mxu1 %v4298_v8  ;;  %v4382_v7 = vld [vmem:[#allocation7 + $0x64c] ss:$16 sps:$4 sm:$0xff]   ;;  %v4377_v8 = vld [vmem:[#allocation7 + $0x448] ss:$16 sps:$4 sm:$0xff]  }
 0x337   :  { %2838 = vmatpush1.bf16.msra.mxu0 %v4293_v9  ;;  %v4380_v9 = vld [vmem:[#allocation7 + $0x648] ss:$16 sps:$4 sm:$0xff]  }
 0x338   :  { %2881 = vmatpush1.bf16.msra.mxu1 %v4296_v10  ;;  %2839 = vmatprep.subr.bf16.mxu0 %v4301_v11  ;;  %v4385_v10 = vld [vmem:[#allocation7 + $0x42c] ss:$16 sps:$4 sm:$0xff]  }
 0x339   :  { %2882 = vmatprep.subr.bf16.mxu1 %v4304_v12  ;;  %v4388_v11 = vld [vmem:[#allocation7 + $0x62c] ss:$16 sps:$4 sm:$0xff]   ;;  %v4383_v12 = vld [vmem:[#allocation7 + $0x428] ss:$16 sps:$4 sm:$0xff]  }
 0x33b   :  { %2840 = vmatpush2.bf16.msra.mxu0 %v4299_v13  ;;  %v4386_v13 = vld [vmem:[#allocation7 + $0x628] ss:$16 sps:$4 sm:$0xff]  }
 0x33c   :  { %2883 = vmatpush2.bf16.msra.mxu1 %v4302_v20  ;;  %2841 = vmatprep.subr.bf16.mxu0 %v4307_v21  ;;  %v4391_v20 = vld [vmem:[#allocation7 + $0x40c] ss:$16 sps:$4 sm:$0xff]  }
 0x33d   :  { %2884 = vmatprep.subr.bf16.mxu1 %v4310_v22  ;;  %v4394_v21 = vld [vmem:[#allocation7 + $0x60c] ss:$16 sps:$4 sm:$0xff]   ;;  %v4389_v22 = vld [vmem:[#allocation7 + $0x408] ss:$16 sps:$4 sm:$0xff]  }
 0x33f   :  { %2842 = vmatpush2.bf16.msra.mxu0 %v4305_v23  ;;  %v4392_v23 = vld [vmem:[#allocation7 + $0x608] ss:$16 sps:$4 sm:$0xff]  }
 0x340   :  { %2885 = vmatpush2.bf16.msra.mxu1 %v4308_v24  ;;  %2843 = vmatprep.subr.bf16.mxu0 %v4313_v25  ;;  %v4397_v24 = vld [vmem:[#allocation7 + $0x5ec] ss:$16 sps:$4 sm:$0xff]  }
 0x341   :  { %2886 = vmatprep.subr.bf16.mxu1 %v4316_v26  ;;  %v4400_v25 = vld [vmem:[#allocation7 + $0x7ec] ss:$16 sps:$4 sm:$0xff]   ;;  %v4395_v26 = vld [vmem:[#allocation7 + $0x5e8] ss:$16 sps:$4 sm:$0xff]  }
 0x343   :  { %2844 = vmatpush2.bf16.msra.mxu0 %v4311_v19  ;;  %v4398_v19 = vld [vmem:[#allocation7 + $0x7e8] ss:$16 sps:$4 sm:$0xff]  }
 0x344   :  { %2887 = vmatpush2.bf16.msra.mxu1 %v4314_v29  ;;  %2845 = vmatprep.subr.bf16.mxu0 %v4319_v30  ;;  %v4403_v29 = vld [vmem:[#allocation7 + $0x5cc] ss:$16 sps:$4 sm:$0xff]  }
 0x345   :  { %2888 = vmatprep.subr.bf16.mxu1 %v4322_v31  ;;  %v4406_v30 = vld [vmem:[#allocation7 + $0x7cc] ss:$16 sps:$4 sm:$0xff]   ;;  %v4401_v31 = vld [vmem:[#allocation7 + $0x5c8] ss:$16 sps:$4 sm:$0xff]  }
 0x347   :  { %2846 = vmatpush2.bf16.msra.mxu0 %v4317_v32  ;;  %v4404_v32 = vld [vmem:[#allocation7 + $0x7c8] ss:$16 sps:$4 sm:$0xff]  }
 0x348   :  { %2889 = vmatpush2.bf16.msra.mxu1 %v4320_v33  ;;  %2847 = vmatprep.subr.bf16.mxu0 %v4325_v18  ;;  %v4409_v33 = vld [vmem:[#allocation7 + $0x5ac] ss:$16 sps:$4 sm:$0xff]  }
 0x349   :  { %2890 = vmatprep.subr.bf16.mxu1 %v4328_v34  ;;  %v4412_v18 = vld [vmem:[#allocation7 + $0x7ac] ss:$16 sps:$4 sm:$0xff]   ;;  %v4407_v34 = vld [vmem:[#allocation7 + $0x5a8] ss:$16 sps:$4 sm:$0xff]  }
 0x34b   :  { %2848 = vmatpush2.bf16.msra.mxu0 %v4323_v35  ;;  %v4410_v35 = vld [vmem:[#allocation7 + $0x7a8] ss:$16 sps:$4 sm:$0xff]  }
 0x34c   :  { %2891 = vmatpush2.bf16.msra.mxu1 %v4326_v36  ;;  %2849 = vmatprep.subr.bf16.mxu0 %v4331_v27  ;;  %v4415_v36 = vld [vmem:[#allocation7 + $0x58c] ss:$16 sps:$4 sm:$0xff]  }
 0x34d   :  { %2892 = vmatprep.subr.bf16.mxu1 %v4334_v37  ;;  %v4418_v27 = vld [vmem:[#allocation7 + $0x78c] ss:$16 sps:$4 sm:$0xff]   ;;  %v4413_v37 = vld [vmem:[#allocation7 + $0x588] ss:$16 sps:$4 sm:$0xff]  }
 0x34f   :  { %2850 = vmatpush2.bf16.msra.mxu0 %v4329_v28  ;;  %v4416_v28 = vld [vmem:[#allocation7 + $0x788] ss:$16 sps:$4 sm:$0xff]  }
 0x350   :  { %2893 = vmatpush2.bf16.msra.mxu1 %v4332_v38  ;;  %2851 = vmatprep.subr.bf16.mxu0 %v4337_v15  ;;  %v4421_v38 = vld [vmem:[#allocation7 + $0x56c] ss:$16 sps:$4 sm:$0xff]  }
 0x351   :  { %2894 = vmatprep.subr.bf16.mxu1 %v4340_v40  ;;  %v4424_v15 = vld [vmem:[#allocation7 + $0x76c] ss:$16 sps:$4 sm:$0xff]   ;;  %v4419_v40 = vld [vmem:[#allocation7 + $0x568] ss:$16 sps:$4 sm:$0xff]  }
 0x353   :  { %2852 = vmatpush2.bf16.msra.mxu0 %v4335_v41  ;;  %v4422_v41 = vld [vmem:[#allocation7 + $0x768] ss:$16 sps:$4 sm:$0xff]  }
 0x354   :  { %2895 = vmatpush2.bf16.msra.mxu1 %v4338_v42  ;;  %2853 = vmatprep.subr.bf16.mxu0 %v4343_v43  ;;  %v4427_v42 = vld [vmem:[#allocation7 + $0x54c] ss:$16 sps:$4 sm:$0xff]  }
 0x355   :  { %2896 = vmatprep.subr.bf16.mxu1 %v4346_v44  ;;  %v4430_v43 = vld [vmem:[#allocation7 + $0x74c] ss:$16 sps:$4 sm:$0xff]   ;;  %v4425_v44 = vld [vmem:[#allocation7 + $0x548] ss:$16 sps:$4 sm:$0xff]  }
 0x357   :  { %2854 = vmatpush2.bf16.msra.mxu0 %v4341_v48  ;;  %v4428_v48 = vld [vmem:[#allocation7 + $0x748] ss:$16 sps:$4 sm:$0xff]  }
 0x358   :  { %2897 = vmatpush2.bf16.msra.mxu1 %v4344_v49  ;;  %2909 = vmatprep.subr.bf16.mxu0 %v4349_v52  ;;  %v4433_v49 = vld [vmem:[#allocation7 + $0x52c] ss:$16 sps:$4 sm:$0xff]  }
 0x359   :  { %2952 = vmatprep.subr.bf16.mxu1 %v4352_v53  ;;  %v4436_v52 = vld [vmem:[#allocation7 + $0x72c] ss:$16 sps:$4 sm:$0xff]   ;;  %v4431_v53 = vld [vmem:[#allocation7 + $0x528] ss:$16 sps:$4 sm:$0xff]  }
 0x35a   :  { %2856 = vmatmul.mubr.bf16.vlgmr.msra.gmra.mxu0 %v4784_v50  ;;  %v4362_v50 = vld [vmem:[#allocation7 + $0x6a8] ss:$16 sps:$4 sm:$0xff]  }
 0x35b   :  { %2899 = vmatmul.mubr.bf16.vlgmr.msra.gmra.mxu1 %v4786_v51  ;;  %2910 = vmatpush1.bf16.msra.mxu0 %v4347_v54  ;;  %v4370_v51 = vld [vmem:[#allocation7 + $0x68c] ss:$16 sps:$4 sm:$0xff]   ;;  %v4434_v54 = vld [vmem:[#allocation7 + $0x728] ss:$16 sps:$4 sm:$0xff]  }
 0x35c   :  { %2941 = vmatprep.mubr.bf16.mxu0 %v4804_v0  ;;  %2953 = vmatpush1.bf16.msra.mxu1 %v4350_v55  ;;  %v4368_v0 = vld [vmem:[#allocation7 + $0x688] ss:$16 sps:$4 sm:$0xff]   ;;  %v4439_v55 = vld [vmem:[#allocation7 + $0x50c] ss:$16 sps:$4 sm:$0xff]  }
 0x35d   :  { %2984 = vmatprep.mubr.bf16.mxu1 %v4806_v45  ;;  %2911 = vmatprep.subr.bf16.mxu0 %v4355_v46  ;;  %v4371_v45 = vld [vmem:[#allocation7 + $0x468] ss:$16 sps:$4 sm:$0xff]   ;;  %v4442_v46 = vld [vmem:[#allocation7 + $0x70c] ss:$16 sps:$4 sm:$0xff]  }
 0x35e   :  { %2954 = vmatprep.subr.bf16.mxu1 %v4358_v56  ;;  %v4437_v56 = vld [vmem:[#allocation7 + $0x508] ss:$16 sps:$4 sm:$0xff]  }
 0x35f   :  { %2912 = vmatpush1.bf16.msra.mxu0 %v4353_v47  ;;  %v4440_v47 = vld [vmem:[#allocation7 + $0x708] ss:$16 sps:$4 sm:$0xff]  }
 0x360   :  { %2955 = vmatpush1.bf16.msra.mxu1 %v4356_v57  ;;  %2913 = vmatprep.subr.bf16.mxu0 %v4361_v58  ;;  %v4443_v57 = vld [vmem:[#allocation9 + $0x78] sm:$0xff]  }
 0x361   :  { %2956 = vmatprep.subr.bf16.mxu1 %v4364_v62  ;;  %v4444_v58 = vld [vmem:[#allocation9 + $0x38] sm:$0xff]   ;;  %v4445_v62 = vld [vmem:[#allocation9 + $0x70] sm:$0xff]  }
 0x363   :  { %2914 = vmatpush1.bf16.msra.mxu0 %v4359_v63  ;;  %v4446_v63 = vld [vmem:[#allocation9 + $0x30] sm:$0xff]  }
 0x364   :  { %2957 = vmatpush1.bf16.msra.mxu1 %v4362_v50  ;;  %2915 = vmatprep.subr.bf16.mxu0 %v4367_v1  ;;  %v4447_v50 = vld [vmem:[#allocation9 + $0x68] sm:$0xff]  }
 0x365   :  { %2958 = vmatprep.subr.bf16.mxu1 %v4370_v51  ;;  %v4448_v1 = vld [vmem:[#allocation9 + $0x28] sm:$0xff]   ;;  %v4449_v51 = vld [vmem:[#allocation9 + $0x60] sm:$0xff]  }
 0x367   :  { %2916 = vmatpush1.bf16.msra.mxu0 %v4365_v2  ;;  %v4450_v2 = vld [vmem:[#allocation9 + $0x20] sm:$0xff]  }
 0x368   :  { %2959 = vmatpush1.bf16.msra.mxu1 %v4368_v0  ;;  %2917 = vmatprep.subr.bf16.mxu0 %v4373_v3  ;;  %v4459_v0 = vld [vmem:[#allocation9 + $0xf8] sm:$0xff]  }
 0x369   :  { %2960 = vmatprep.subr.bf16.mxu1 %v4376_v4  ;;  %v4460_v3 = vld [vmem:[#allocation9 + $0xb8] sm:$0xff]   ;;  %v4461_v4 = vld [vmem:[#allocation9 + $0xf0] sm:$0xff]  }
 0x36b   :  { %2918 = vmatpush1.bf16.msra.mxu0 %v4371_v45  ;;  %v4451_v45 = vld [vmem:[#allocation9 + $0x58] sm:$0xff]  }
 0x36c   :  { %2961 = vmatpush1.bf16.msra.mxu1 %v4374_v5  ;;  %2919 = vmatprep.subr.bf16.mxu0 %v4379_v6  ;;  %v4463_v5 = vld [vmem:[#allocation9 + $0xe8] sm:$0xff]   ;;  %v4453_v6 = vld [vmem:[#allocation9 + $0x50] sm:$0xff]  }
 0x36d   :  { %2962 = vmatprep.subr.bf16.mxu1 %v4382_v7  ;;  %v4464_v7 = vld [vmem:[#allocation9 + $0xa8] sm:$0xff]  }
 0x36f   :  { %2920 = vmatpush1.bf16.msra.mxu0 %v4377_v8  ;;  %v4454_v8 = vld [vmem:[#allocation9 + $0x10] sm:$0xff]  }
 0x370   :  { %2963 = vmatpush1.bf16.msra.mxu1 %v4380_v9  ;;  %2921 = vmatprep.subr.bf16.mxu0 %v4385_v10  ;;  %v4465_v9 = vld [vmem:[#allocation9 + $0xe0] sm:$0xff]   ;;  %v4455_v10 = vld [vmem:[#allocation9 + $0x48] sm:$0xff]  }
 0x371   :  { %2964 = vmatprep.subr.bf16.mxu1 %v4388_v11  ;;  %v4466_v11 = vld [vmem:[#allocation9 + $0xa0] sm:$0xff]  }
 0x373   :  { %2922 = vmatpush1.bf16.msra.mxu0 %v4383_v12  ;;  %v4456_v12 = vld [vmem:[#allocation9 + $0x8] sm:$0xff]  }
 0x374   :  { %2965 = vmatpush1.bf16.msra.mxu1 %v4386_v13  ;;  %2923 = vmatprep.subr.bf16.mxu0 %v4391_v20  ;;  %v4457_v13 = vld [vmem:[#allocation9 + $0x40] sm:$0xff]  }
 0x375   :  { %2966 = vmatprep.subr.bf16.mxu1 %v4394_v21  ;;  %v4458_v20 = vld [vmem:[#allocation9] sm:$0xff]  }
 0x377   :  { %2924 = vmatpush1.bf16.msra.mxu0 %v4389_v22 }
 0x378   :  { %2967 = vmatpush1.bf16.msra.mxu1 %v4392_v23  ;;  %2925 = vmatprep.subr.bf16.mxu0 %v4397_v24 }
 0x379   :  { %2968 = vmatprep.subr.bf16.mxu1 %v4400_v25  ;;  %v4835_v25 = vld [vmem:[%s4873_s8] sm:$0xf] }
 0x37b   :  { %2926 = vmatpush2.bf16.msra.mxu0 %v4395_v26  ;;  %v1358_v26 = vrot.slane %v4835_v25, %v4741_v60 }
 0x37c   :  { %2969 = vmatpush2.bf16.msra.mxu1 %v4398_v19  ;;  %2927 = vmatprep.subr.bf16.mxu0 %v4403_v29  ;;  %v1354_v19 = vrot.slane %v4835_v25, %v4744_v61 }
 0x37d   :  { %2970 = vmatprep.subr.bf16.mxu1 %v4406_v30 }
 0x37f   :  { %2928 = vmatpush2.bf16.msra.mxu0 %v4401_v31 }
 0x380   :  { %2971 = vmatpush2.bf16.msra.mxu1 %v4404_v32  ;;  %2929 = vmatprep.subr.bf16.mxu0 %v4409_v33 }
 0x381   :  { %2972 = vmatprep.subr.bf16.mxu1 %v4412_v18 }
 0x383   :  { %2930 = vmatpush2.bf16.msra.mxu0 %v4407_v34 }
 0x384   :  { %2973 = vmatpush2.bf16.msra.mxu1 %v4410_v35  ;;  %2931 = vmatprep.subr.bf16.mxu0 %v4415_v36 }
 0x385   :  { %2974 = vmatprep.subr.bf16.mxu1 %v4418_v27  ;;  %v4467_v27 = vld [vmem:[#allocation9 + $0xd8] sm:$0xff]  }
 0x387   :  { %2932 = vmatpush2.bf16.msra.mxu0 %v4413_v37 }
 0x388   :  { %2975 = vmatpush2.bf16.msra.mxu1 %v4416_v28  ;;  %2933 = vmatprep.subr.bf16.mxu0 %v4421_v38  ;;  %v4468_v38 = vld [vmem:[#allocation9 + $0x98] sm:$0xff]  }
 0x389   :  { %2976 = vmatprep.subr.bf16.mxu1 %v4424_v15 }
 0x38b   :  { %2934 = vmatpush2.bf16.msra.mxu0 %v4419_v40 }
 0x38c   :  { %2977 = vmatpush2.bf16.msra.mxu1 %v4422_v41  ;;  %2935 = vmatprep.subr.bf16.mxu0 %v4427_v42 }
 0x38d   :  { %2978 = vmatprep.subr.bf16.mxu1 %v4430_v43 }
 0x38f   :  { %2936 = vmatpush2.bf16.msra.mxu0 %v4425_v44 }
 0x390   :  { %2979 = vmatpush2.bf16.msra.mxu1 %v4428_v48  ;;  %2937 = vmatprep.subr.bf16.mxu0 %v4433_v49  ;;  %v4469_v48 = vld [vmem:[#allocation9 + $0xd0] sm:$0xff]  }
 0x391   :  { %2980 = vmatprep.subr.bf16.mxu1 %v4436_v52 }
 0x393   :  { %2938 = vmatpush2.bf16.msra.mxu0 %v4431_v53  ;;  %v4470_v53 = vld [vmem:[#allocation9 + $0x90] sm:$0xff]  }
 0x394   :  { %2981 = vmatpush2.bf16.msra.mxu1 %v4434_v54  ;;  %2939 = vmatprep.subr.bf16.mxu0 %v4439_v55 }
 0x395   :  { %2982 = vmatprep.subr.bf16.mxu1 %v4442_v46 }
 0x397   :  { %2940 = vmatpush2.bf16.msra.mxu0 %v4437_v56 }
 0x398   :  { %2983 = vmatpush2.bf16.msra.mxu1 %v4440_v47  ;;  %3928 = vmatprep.subr.bf16.mxu0 %v4443_v57 }
 0x399   :  { %3950 = vmatprep.subr.bf16.mxu1 %v4459_v0  ;;  %v4473_v0 = vld [vmem:[#allocation9 + $0xc0] sm:$0xff]  }
 0x39a   :  { %2942 = vmatmul.mubr.bf16.vlgmr.msra.gmra.mxu0 %v4818_v39  ;;  %v4462_v39 = vld [vmem:[#allocation9 + $0xb0] sm:$0xff]   ;;  %v2685_v21 = vpop.f32.mrf.mxu0  ;;  %v2728_v22 = vpop.f32.mrf.mxu1 }
 0x39b   :  { %2985 = vmatmul.mubr.bf16.vlgmr.msra.gmra.mxu1 %v4820_v14  ;;  %3929 = vmatpush3.bf16.msra.mxu0 %v4444_v58  ;;  %v4452_v14 = vld [vmem:[#allocation9 + $0x18] sm:$0xff]   ;;  %v2686_v32 = vadd.f32 %v2685_v21, %v1354_v19  ;;  %v4471_v58 = vld [vmem:[#allocation9 + $0xc8] sm:$0xff]  }
 0x39c   :  { %3930 = vmatprep.subr.bf16.mxu0 %v4445_v62  ;;  %3951 = vmatpush3.bf16.msra.mxu1 %v4460_v3  ;;  %v2687_v23 = vpop.f32.mrf.mxu0  ;;  %v2730_v24 = vpop.f32.mrf.mxu1 }
 0x39d   :  { %3952 = vmatprep.subr.bf16.mxu1 %v4461_v4  ;;  %v2688_v31 = vadd.f32 %v2687_v23, %v1358_v26  ;;  %v2729_v15 = vadd.f32 %v2728_v22, %v2686_v32  ;;  %v4474_v4 = vld [vmem:[#allocation9 + $0x80] sm:$0xff]  }
 0x39e   :  { %v2689_v29 = vpop.f32.mrf.mxu0  ;;  %v2732_v30 = vpop.f32.mrf.mxu1 }
 0x39f   :  { %3931 = vmatpush3.bf16.msra.mxu0 %v4446_v63  ;;  %v2690_v34 = vadd.f32 %v2689_v29, %v1354_v19  ;;  %v2731_v37 = vadd.f32 %v2730_v24, %v2688_v31  ;;  %v4472_v63 = vld [vmem:[#allocation9 + $0x88] sm:$0xff]  }
 0x3a0   :  { %3932 = vmatprep.subr.bf16.mxu0 %v4447_v50  ;;  %3953 = vmatpush3.bf16.msra.mxu1 %v4462_v39  ;;  %v2691_v33 = vpop.f32.mrf.mxu0  ;;  %v2734_v18 = vpop.f32.mrf.mxu1  ;;  %v4475_v39 = vld [vmem:[#allocation10 + $0x38] sm:$0xff]  }
 0x3a1   :  { %3954 = vmatprep.subr.bf16.mxu1 %v4463_v5  ;;  %v2692_v28 = vadd.f32 %v2691_v33, %v1358_v26  ;;  %v2733_v60 = vadd.f32 %v2732_v30, %v2690_v34  ;;  %v4476_v5 = vld [vmem:[#allocation10 + $0x30] sm:$0xff]  }
 0x3a3   :  { %3933 = vmatpush3.bf16.msra.mxu0 %v4448_v1  ;;  %v2735_v49 = vadd.f32 %v2734_v18, %v2692_v28 }
 0x3a4   :  { %3934 = vmatprep.subr.bf16.mxu0 %v4449_v51  ;;  %3955 = vmatpush3.bf16.msra.mxu1 %v4464_v7  ;;  %v4478_v7 = vld [vmem:[#allocation10 + $0x20] sm:$0xff]  }
 0x3a5   :  { %3956 = vmatprep.subr.bf16.mxu1 %v4465_v9 }
 0x3a7   :  { %3935 = vmatpush3.bf16.msra.mxu0 %v4450_v2 }
 0x3a8   :  { %3936 = vmatprep.subr.bf16.mxu0 %v4451_v45  ;;  %3957 = vmatpush3.bf16.msra.mxu1 %v4466_v11 }
 0x3a9   :  { %3958 = vmatprep.subr.bf16.mxu1 %v4467_v27 }
 0x3ab   :  { %3937 = vmatpush3.bf16.msra.mxu0 %v4452_v14  ;;  %v4634_v14 = vmov 0.0  }
 0x3ac   :  { %3938 = vmatprep.subr.bf16.mxu0 %v4453_v6  ;;  %3959 = vmatpush3.bf16.msra.mxu1 %v4468_v38  ;;  %v4477_v6 = vld [vmem:[#allocation10 + $0x28] sm:$0xff]  }
 0x3ad   :  { %3960 = vmatprep.subr.bf16.mxu1 %v4469_v48 }
 0x3af   :  { %3939 = vmatpush3.bf16.msra.mxu0 %v4454_v8 }
 0x3b0   :  { %3940 = vmatprep.subr.bf16.mxu0 %v4455_v10  ;;  %3961 = vmatpush3.bf16.msra.mxu1 %v4470_v53  ;;  %v4480_v53 = vld [vmem:[#allocation10 + $0x10] sm:$0xff]  }
 0x3b1   :  { %3962 = vmatprep.subr.bf16.mxu1 %v4471_v58 }
 0x3b3   :  { %3941 = vmatpush3.bf16.msra.mxu0 %v4456_v12  ;;  %v1366_v12 = vrot.slane %v4835_v25, %v551_v16 }
 0x3b4   :  { %3942 = vmatprep.subr.bf16.mxu0 %v4457_v13  ;;  %3963 = vmatpush3.bf16.msra.mxu1 %v4472_v63  ;;  %v1362_v13 = vrot.slane %v4835_v25, %v547_v17  ;;  %v3853_v63 = vld [vmem:[%s4875_s10] ss:$0 sm:$0xff] }
 0x3b5   :  { %3964 = vmatprep.subr.bf16.mxu1 %v4473_v0 }
 0x3b7   :  { %3943 = vmatpush3.bf16.msra.mxu0 %v4458_v20 }
 0x3b8   :  { %3965 = vmatpush3.bf16.msra.mxu1 %v4474_v4  ;;  %3981 = vmatprep.subr.bf16.mxu0 %v4634_v14 }
 0x3da   :  { %v2771_v35 = vpop.f32.mrf.mxu0  ;;  %v2814_v36 = vpop.f32.mrf.mxu1 }
 0x3db   :  { %v2772_v61 = vadd.f32 %v2771_v35, %v2729_v15 }
 0x3dc   :  { %v2773_v40 = vpop.f32.mrf.mxu0  ;;  %v2816_v41 = vpop.f32.mrf.mxu1 }
 0x3dd   :  { %v2774_v42 = vadd.f32 %v2773_v40, %v2731_v37  ;;  %v2815_v47 = vadd.f32 %v2814_v36, %v2772_v61 }
 0x3de   :  { %v2775_v43 = vpop.f32.mrf.mxu0  ;;  %v2818_v44 = vpop.f32.mrf.mxu1 }
 0x3df   :  { %v2776_v52 = vadd.f32 %v2775_v43, %v2733_v60  ;;  %v2817_v55 = vadd.f32 %v2816_v41, %v2774_v42  ;;  %v2995_v2 = vmax.f32 %v2815_v47, 0.0 }
 0x3e0   :  { %v2777_v54 = vpop.f32.mrf.mxu0  ;;  %v2820_v57 = vpop.f32.mrf.mxu1 }
 0x3e1   :  { %v2819_v46 = vadd.f32 %v2818_v44, %v2776_v52  ;;  %v2778_v56 = vadd.f32 %v2777_v54, %v2735_v49  ;;  %v2996_v1 = vmax.f32 %v2817_v55, 0.0  ;;  %v4479_v52 = vld [vmem:[#allocation10 + $0x18] sm:$0xff]   ;;  %v4481_v54 = vld [vmem:[#allocation10 + $0x8] sm:$0xff]   ;;  %v4482_v55 = vld [vmem:[#allocation10] sm:$0xff]  }
 0x3e3   :  { %v2821_v62 = vadd.f32 %v2820_v57, %v2778_v56  ;;  %v2999_v50 = vmax.f32 %v2819_v46, 0.0 }
 0x3e5   :  { %v3000_v51 = vmax.f32 %v2821_v62, 0.0  ;;  %v3003_v45 = vpack.c.bf16 %v2999_v50, %v2995_v2 }
 0x3e7   :  { %v3004_v3 = vpack.c.bf16 %v3000_v51, %v2996_v1 }
 0x3e9   :  { %3302 = vmatprep.mubr.bf16.mxu0 %v3004_v3 }
 0x3ea   :  { %3303 = vmatmul.mubr.bf16.vlgmr.msra.gmra.mxu0 %v3003_v45 }
 0x3eb   :  { %3982 = vmatpush3.bf16.msra.mxu0 %v4475_v39  ;;  %3997 = vmatprep.mubr.msk.bf16.mxu0 %vm4635_vm0, %v4634_v14 }
 0x3ec   :  { %3983 = vmatprep.subr.bf16.mxu0 %v4634_v14 }
 0x3ef   :  { %3984 = vmatpush3.bf16.msra.mxu0 %v4476_v5 }
 0x3f0   :  { %3985 = vmatprep.subr.bf16.mxu0 %v4634_v14 }
 0x3f3   :  { %3986 = vmatpush3.bf16.msra.mxu0 %v4477_v6 }
 0x3f4   :  { %3987 = vmatprep.subr.bf16.mxu0 %v4634_v14 }
 0x3f7   :  { %3988 = vmatpush3.bf16.msra.mxu0 %v4478_v7 }
 0x3f8   :  { %3989 = vmatprep.subr.bf16.mxu0 %v4634_v14 }
 0x3fb   :  { %3990 = vmatpush3.bf16.msra.mxu0 %v4479_v52 }
 0x3fc   :  { %3991 = vmatprep.subr.bf16.mxu0 %v4634_v14 }
 0x3ff   :  { %3992 = vmatpush3.bf16.msra.mxu0 %v4480_v53 }
 0x400   :  { %3993 = vmatprep.subr.bf16.mxu0 %v4634_v14 }
 0x403   :  { %3994 = vmatpush3.bf16.msra.mxu0 %v4481_v54 }
 0x404   :  { %3995 = vmatprep.subr.bf16.mxu0 %v4634_v14 }
 0x407   :  { %3996 = vmatpush3.bf16.msra.mxu0 %v4482_v55 }
 0x41a   :  { %v2857_v8 = vpop.f32.mrf.mxu0 }
 0x41b   :  { %v2900_v9 = vpop.f32.mrf.mxu1  ;;  %v2858_v23 = vadd.f32 %v2857_v8, %v1362_v13  ;;  %v3886_v8 = vld [vmem:[%s4877_s12] ss:$0 sm:$0xff] }
 0x41c   :  { %v2859_v10 = vpop.f32.mrf.mxu0 }
 0x41d   :  { %v2902_v11 = vpop.f32.mrf.mxu1  ;;  %v2860_v22 = vadd.f32 %v2859_v10, %v1366_v12  ;;  %v2901_v33 = vadd.f32 %v2900_v9, %v2858_v23 }
 0x41e   :  { %v2861_v20 = vpop.f32.mrf.mxu0 }
 0x41f   :  { %v2904_v21 = vpop.f32.mrf.mxu1  ;;  %v2862_v26 = vadd.f32 %v2861_v20, %v1362_v13  ;;  %v2903_v30 = vadd.f32 %v2902_v11, %v2860_v22 }
 0x420   :  { %v2863_v24 = vpop.f32.mrf.mxu0 }
 0x421   :  { %v2906_v19 = vpop.f32.mrf.mxu1  ;;  %v2864_v31 = vadd.f32 %v2863_v24, %v1366_v12  ;;  %v2905_v34 = vadd.f32 %v2904_v21, %v2862_v26 }
 0x423   :  { %v2907_v27 = vadd.f32 %v2906_v19, %v2864_v31 }
 0x45a   :  { %v2943_v29 = vpop.f32.mrf.mxu0 }
 0x45b   :  { %v2986_v32 = vpop.f32.mrf.mxu1  ;;  %v2944_v36 = vadd.f32 %v2943_v29, %v2901_v33 }
 0x45c   :  { %v2945_v18 = vpop.f32.mrf.mxu0 }
 0x45d   :  { %v2946_v35 = vadd.f32 %v2945_v18, %v2903_v30  ;;  %v2988_v16 = vpop.f32.mrf.mxu1  ;;  %v2987_v40 = vadd.f32 %v2986_v32, %v2944_v36 }
 0x45e   :  { %v2947_v59 = vpop.f32.mrf.mxu0 }
 0x45f   :  { %v2948_v17 = vadd.f32 %v2947_v59, %v2905_v34  ;;  %v2990_v25 = vpop.f32.mrf.mxu1  ;;  %v2989_v28 = vadd.f32 %v2988_v16, %v2946_v35  ;;  %v2997_v44 = vmax.f32 %v2987_v40, 0.0 }
 0x460   :  { %v2949_v37 = vpop.f32.mrf.mxu0 }
 0x461   :  { %v2991_v38 = vadd.f32 %v2990_v25, %v2948_v17  ;;  %v2950_v15 = vadd.f32 %v2949_v37, %v2907_v27  ;;  %v2992_v41 = vpop.f32.mrf.mxu1  ;;  %v2998_v61 = vmax.f32 %v2989_v28, 0.0 }
 0x463   :  { %v2993_v60 = vadd.f32 %v2992_v41, %v2950_v15  ;;  %v3001_v42 = vmax.f32 %v2991_v38, 0.0 }
 0x465   :  { %v3002_v43 = vmax.f32 %v2993_v60, 0.0  ;;  %v3005_v49 = vpack.c.bf16 %v3001_v42, %v2997_v44 }
 0x467   :  { %v3006_v48 = vpack.c.bf16 %v3002_v43, %v2998_v61 }
 0x469   :  { %3343 = vmatprep.mubr.bf16.mxu1 %v3006_v48 }
 0x46a   :  { %3344 = vmatmul.mubr.bf16.vlgmr.msra.gmra.mxu1 %v3005_v49 }
 0x4aa   :  { %v3944_v46 = vpop.f32.mrf.mxu0 }
 0x4ac   :  { %v3945_v56 = vpop.f32.mrf.mxu0 }
 0x4ad   :  { %v3946_v62 = vadd.f32 %v3945_v56, %v3944_v46 }
 0x4ae   :  { %v3947_v47 = vpop.f32.mrf.mxu0 }
 0x4af   :  { %v3305_v0 = vadd.f32 %v3946_v62, %v3853_v63 }
 0x4b0   :  { %v3948_v57 = vpop.f32.mrf.mxu0 }
 0x4b1   :  { %v3949_v1 = vadd.f32 %v3948_v57, %v3947_v47 }
 0x4b3   :  { %v3308_v4 = vadd.f32 %v3949_v1, %v3853_v63 }
 0x52a   :  { %v3966_v58 = vpop.f32.mrf.mxu1 }
 0x52c   :  { %v3967_v50 = vpop.f32.mrf.mxu1 }
 0x52d   :  { %v3968_v51 = vadd.f32 %v3967_v50, %v3966_v58 }
 0x52e   :  { %v3969_v2 = vpop.f32.mrf.mxu1 }
 0x52f   :  { %v3346_v45 = vadd.f32 %v3968_v51, %v3305_v0 }
 0x530   :  { %v3970_v3 = vpop.f32.mrf.mxu1 }
 0x531   :  { %v3971_v39 = vadd.f32 %v3970_v3, %v3969_v2  ;;  %v3352_v5 = vmax.f32 %v3346_v45, 0.0 }
 0x533   :  { %v3349_v14 = vadd.f32 %v3971_v39, %v3308_v4 }
 0x535   :  { %v3353_v6 = vmax.f32 %v3349_v14, 0.0 }
 0x537   :  { %v3354_v7 = vpack.c.bf16 %v3353_v6, %v3352_v5 }
 0x539   :  { %3998 = vmatmul.mubr.bf16.vlgmr.msra.gmra.mxu0 %v3354_v7 }
 0x5f9   :  { %v3460_v9 = vpop.f32.mrf.mxu0 }
 0x5fa   :  { %v3461_v10 = vadd.f32 %v3886_v8, %v3460_v9 }
 0x5fb   :  { %v3999_v11 = vpop.f32.mrf.mxu0 }
 0x5fc   :  { %v3895_v12 = vclamps-f32 %v3461_v10, 30.0 }
 0x5fd   :  { %v3463_v13 = vpop.f32.mrf.mxu0 }
 0x5fe   :  { %v3471_v20 = vsub.f32 0.0, %v3895_v12  ;;  %v3464_v21 = vadd.f32 %v3886_v8, %v3463_v13 }
 0x5ff   :  { %v4000_v22 = vpop.f32.mrf.mxu0 }
 0x600   :  { %v3473_v23 = vmul.f32 1.442695, %v3471_v20  ;;  %v3896_v24 = vclamps-f32 %v3464_v21, 30.0 }
 0x602   :  { %4483 = vpow2.f32 %v3473_v23  ;;  %v3472_v26 = vsub.f32 0.0, %v3896_v24 }
 0x604   :  { %v3475_v19 = vmul.f32 1.442695, %v3472_v26 }
 0x606   :  { %4485 = vpow2.f32 %v3475_v19 }
 0x60f   :  { %v4484_v29 = vpop.eup %4483 }
 0x610   :  { %v3477_v30 = vadd.f32 1.0, %v4484_v29 }
 0x612   :  { %4487 = vrcp.f32 %v3477_v30 }
 0x613   :  { %v4486_v31 = vpop.eup %4485 }
 0x614   :  { %v3478_v32 = vadd.f32 1.0, %v4486_v31 }
 0x616   :  { %4489 = vrcp.f32 %v3478_v32 }
 0x61f   :  { %v4488_v33 = vpop.eup %4487 }
 0x623   :  { %v4490_v18 = vpop.eup %4489 }
 0x624   :  { %v3904_v34 = vpack.c.bf16 %v4490_v18, %v4488_v33 }
 0x626   :  { %3905 = vst [vmem:[%s4878_s13] sm:$0xff] %v3904_v34  }
 0x627   :  { %3495 = vsyncpa [#allocation3], 1 }
 0x628   :  { %3496 = vsyncpa [#allocation5], 1 }
 0x629   :  { %3497 = vsyncpa [#allocation8], 1 }
 0x62a   :  { %3498 = vsyncpa [#allocation11], 1 }

</bundles_post_ra>
